<compile_context>
chip_gen: v6e
topology: v6e:2x2x1
jax: 0.10.0
libtpu: 0.0.40
codegen_flags: <defaults>
</compile_context>

<pallas_src>
import functools
import math

import jax
import jax.numpy as jnp
from jax.experimental import pallas as pl
from jax.experimental.pallas import tpu as pltpu

EPS = 1e-5


def _round_up(x, m):
    return ((x + m - 1) // m) * m


def _vmem_capacity_bytes():
    try:
        return int(pltpu.get_tpu_info().vmem_capacity_bytes)
    except Exception:
        return 64 * 1024 * 1024  # conservative default (v7x per-core VMEM)


def _pick_block_h(h, w, cout, block_h, vmem_cap, itemsize):
    """Pick the output-row block size TH.

    Constraints: (TH * W) % 128 == 0 (lane-dense last dim of kernel 2's NCHW
    output block; also implies the %8 sublane rule for kernel 1's y block),
    and f32 accumulator + streamed tiles stay a small fraction of VMEM.
    Prefers TH | H so no padded rows / stats masking / final slice is needed.
    """
    u = 128 // math.gcd(w, 128)            # TH must be a multiple of u
    if block_h is not None:
        return _round_up(block_h, u)
    # generation-dependent rows-per-tile target (amortize ~0.35us per grid
    # step; v5e/v6e have 128 MiB VMEM -> bigger tiles than v7x's 64 MiB)
    rows_target = 2048 if vmem_cap >= (96 << 20) else 1024
    per_row_bytes = cout * (4 + 2 * itemsize + 8)   # acc + 2x y tile + out tile
    rows_cap = max(u * w, min(rows_target,
                              (vmem_cap // 8) // max(per_row_bytes, 1)))
    th_cap = max(u, (rows_cap // w) // u * u)
    cand = min(th_cap, (h // u) * u)
    while cand >= u:
        if h % cand == 0:
            return cand
        cand -= u
    return max(u, min(th_cap, _round_up(h, u)))


@functools.partial(
    jax.jit, static_argnames=("kernel_size", "block_h", "compute_dtype"))
def conv_block_forward(x_nchw, conv_weight, gamma, beta, *, kernel_size,
                       block_h=None, compute_dtype=jnp.bfloat16):
    """ConvBlock.forward: Conv2d(stride=1, padding=K//2, bias=False) ->
    BatchNorm2d (training-mode batch statistics, biased variance, eps=1e-5) ->
    ReLU.  x: (N, Cin, H, W) f32, weight: (Cout, Cin, K, K) -> (N, Cout, H, W).
    """
    if kernel_size % 2 != 1:
        raise NotImplementedError("odd kernel_size only")  # TODO(synk): even K
    n, cin, h, w = x_nchw.shape
    cout = conv_weight.shape[0]
    k = kernel_size
    pad = k // 2
    itemsize = jnp.dtype(compute_dtype).itemsize

    # ---- generation-dependent tiling ----
    vmem_cap = _vmem_capacity_bytes()
    vmem_limit = int(vmem_cap * 3 // 4)
    th = _pick_block_h(h, w, cout, block_h, vmem_cap, itemsize)
    nhb_min = pl.cdiv(h, th)
    ncs = 2 if nhb_min >= 2 else 1       # v7x: split row blocks across 2 cores
    nhb_total = _round_up(nhb_min, ncs)
    nhb_per = nhb_total // ncs
    hp = nhb_total * th                  # padded output height
    needs_mask = hp != h

    # ---- XLA glue: layout + spatial zero-padding (no K^2 patch blow-up) ----
    x_nhwc = jnp.transpose(x_nchw, (0, 2, 3, 1)).astype(compute_dtype)
    x_pad = jnp.pad(x_nhwc, ((0, 0), (pad, pad + (hp - h)), (pad, pad), (0, 0)))
    # weight: (Cout, Cin, K, K) -> (K*K, Cin, Cout), tap order (dh, dw)
    w_taps = jnp.transpose(conv_weight, (2, 3, 1, 0)).reshape(k * k, cin, cout)
    w_taps = w_taps.astype(compute_dtype)

    # TODO(synk): stream H-halo row blocks with manual make_async_copy when the
    # full padded image of one batch element does not fit VMEM.

    # ------------------------------------------------------------------
    # Kernel 1: fused im2col conv (K*K shifted MXU matmuls, f32 accumulate)
    #           + per-(split, batch) channel sum / sum-of-squares partials.
    # ------------------------------------------------------------------
    def conv_stats_kernel(x_ref, w_ref, y_ref, sum_ref, sumsq_ref):
        c = pl.program_id(0)
        hb = pl.program_id(2)
        row0 = (c * nhb_per + hb) * th       # first output row of this tile

        acc = jnp.zeros((th * w, cout), jnp.float32)
        for dh in range(k):
            # (th, W+2p, Cin) slab for row tap dh; the halo is free because the
            # whole padded image of this batch element is resident in VMEM.
            slab = x_ref[0, pl.ds(row0 + dh, th), :, :]
            for dw in range(k):
                a = slab[:, dw:dw + w, :].reshape(th * w, cin)
                acc = acc + jnp.dot(a, w_ref[dh * k + dw],
                                    preferred_element_type=jnp.float32)

        # conv activation streamed back in the compute dtype (bf16 by default)
        y_ref[0] = acc.astype(y_ref.dtype)

        if needs_mask:  # exclude rows >= H (bottom padding) from BN statistics
            rows = row0 + jax.lax.broadcasted_iota(
                jnp.int32, (th * w, 1), 0) // w
            acc = jnp.where(rows < h, acc, 0.0)

        @pl.when(hb == 0)
        def _():
            sum_ref[...] = jnp.zeros_like(sum_ref)
            sumsq_ref[...] = jnp.zeros_like(sumsq_ref)

        # TODO(synk): once kernel 1 is MXU-bound (large Cin*K^2), move the
        # channel sum onto the MXU via a ones-vector matmul; today it is free
        # filler while the kernel is HBM-bound.
        sum_ref[0, 0, 0:1, :] += jnp.sum(acc, axis=0, keepdims=True)
        sumsq_ref[0, 0, 0:1, :] += jnp.sum(acc * acc, axis=0, keepdims=True)

    y, sum_parts, sumsq_parts = pl.pallas_call(
        conv_stats_kernel,
        out_shape=(
            jax.ShapeDtypeStruct((n, hp * w, cout), compute_dtype),
            jax.ShapeDtypeStruct((ncs, n, 8, cout), jnp.float32),
            jax.ShapeDtypeStruct((ncs, n, 8, cout), jnp.float32),
        ),
        grid=(ncs, n, nhb_per),
        in_specs=[
            # full padded image of batch element b, resident in VMEM
            pl.BlockSpec((1, hp + 2 * pad, w + 2 * pad, cin),
                         lambda c, b, i: (b, 0, 0, 0)),
            # resident weight taps (constant index map -> fetched once)
            # TODO(synk): pipeline_mode=pl.Buffered(1) to drop the unused
            # second weight buffer once that path is validated on all gens.
            pl.BlockSpec((k * k, cin, cout), lambda c, b, i: (0, 0, 0)),
        ],
        out_specs=(
            pl.BlockSpec((1, th * w, cout),
                         lambda c, b, i: (b, c * nhb_per + i, 0)),
            pl.BlockSpec((1, 1, 8, cout), lambda c, b, i: (c, b, 0, 0)),
            pl.BlockSpec((1, 1, 8, cout), lambda c, b, i: (c, b, 0, 0)),
        ),
        compiler_params=pltpu.CompilerParams(
            dimension_semantics=("parallel", "parallel", "arbitrary"),
            vmem_limit_bytes=vmem_limit,
        ),
    )(x_pad, w_taps)

    # ---- tiny XLA fold of the BatchNorm constants (training-mode stats) ----
    # NOTE: E[y^2]-E[y]^2 in f32 can lose precision when |mean| >> std; fine
    # for conv activations here (acknowledged review concern).
    m_count = float(n * h * w)
    ch_sum = jnp.sum(sum_parts, axis=(0, 1, 2))          # (Cout,)
    ch_sumsq = jnp.sum(sumsq_parts, axis=(0, 1, 2))      # (Cout,)
    mean = ch_sum / m_count
    var = jnp.maximum(ch_sumsq / m_count - mean * mean, 0.0)
    inv_std = jax.lax.rsqrt(var + EPS)
    g32 = gamma.astype(jnp.float32)
    scale = (g32 * inv_std).reshape(1, cout)
    shift = (beta.astype(jnp.float32) - mean * g32 * inv_std).reshape(1, cout)

    # ------------------------------------------------------------------
    # Kernel 2: y*scale + shift, ReLU, in-kernel transpose -> (N, Cout, H*W)
    # layout emitted directly (no extra XLA transpose round trip).
    # NOTE: input_output_aliases intentionally not used: y (bf16, NHWC-flat)
    # and out (f32, NCHW-flat) differ in dtype/layout by design (bf16-y +
    # fused transpose beat aliasing on HBM traffic).
    # ------------------------------------------------------------------
    def bn_relu_kernel(y_ref, scale_ref, shift_ref, out_ref):
        yv = y_ref[0].astype(jnp.float32)                       # (th*w, Cout)
        z = jnp.maximum(yv * scale_ref[...] + shift_ref[...], 0.0)
        out_ref[0] = z.T.astype(out_ref.dtype)                  # (Cout, th*w)

    out_flat = pl.pallas_call(
        bn_relu_kernel,
        out_shape=jax.ShapeDtypeStruct((n, cout, hp * w), jnp.float32),
        grid=(n, nhb_total),
        in_specs=[
            pl.BlockSpec((1, th * w, cout), lambda b, i: (b, i, 0)),
            pl.BlockSpec((1, cout), lambda b, i: (0, 0)),
            pl.BlockSpec((1, cout), lambda b, i: (0, 0)),
        ],
        out_specs=pl.BlockSpec((1, cout, th * w), lambda b, i: (b, 0, i)),
        compiler_params=pltpu.CompilerParams(
            dimension_semantics=("parallel", "parallel"),
            vmem_limit_bytes=vmem_limit,
        ),
    )(y, scale, shift)

    if needs_mask:
        out_flat = out_flat[:, :, :h * w]    # drop padded output rows
    return out_flat.reshape(n, cout, h, w)   # free reshape when hp == h


def reference_forward(x_nchw, conv_weight, gamma, beta, kernel_size):
    """Pure-JAX reference matching the PyTorch module (training-mode BN)."""
    pad = kernel_size // 2
    y = jax.lax.conv_general_dilated(
        x_nchw, conv_weight, window_strides=(1, 1),
        padding=((pad, pad), (pad, pad)),
        dimension_numbers=("NCHW", "OIHW", "NCHW"),
        precision=jax.lax.Precision.HIGHEST)
    mean = jnp.mean(y, axis=(0, 2, 3), keepdims=True)
    var = jnp.mean((y - mean) ** 2, axis=(0, 2, 3), keepdims=True)
    yn = (y - mean) * jax.lax.rsqrt(var + EPS)
    yn = yn * gamma.reshape(1, -1, 1, 1) + beta.reshape(1, -1, 1, 1)
    return jnp.maximum(yn, 0.0)


if __name__ == "__main__":
    # Small deterministic configuration consistent with ConvBlock(inplanes=4,
    # planes=8, kernel_size=3, stride=1).
    N, Cin, H, W = 2, 4, 16, 16
    Cout, K = 8, 3

    key = jax.random.PRNGKey(0)
    kx, kw, kg, kb = jax.random.split(key, 4)

    x = jax.random.normal(kx, (N, Cin, H, W), dtype=jnp.float32)
    conv_weight = 0.1 * jax.random.normal(kw, (Cout, Cin, K, K), dtype=jnp.float32)
    gamma = 1.0 + 0.1 * jax.random.normal(kg, (Cout,), dtype=jnp.float32)
    beta = 0.1 * jax.random.normal(kb, (Cout,), dtype=jnp.float32)

    ref = reference_forward(x, conv_weight, gamma, beta, K)

    # f32 streaming path, block_h=8: 2 row blocks per image -> exercises the
    # dual-core split (ncs=2), per-(split,batch) stat partials, and the fused
    # NCHW-emitting epilogue.
    out_f32 = conv_block_forward(x, conv_weight, gamma, beta, kernel_size=K,
                                 block_h=8, compute_dtype=jnp.float32)
    out_f32 = jax.block_until_ready(out_f32)
    assert out_f32.shape == (N, Cout, H, W)
    assert jnp.allclose(out_f32, ref, atol=2e-2, rtol=2e-2), "f32 mismatch vs reference"

    # bf16 streaming path with auto (generation-dependent) tiling; conv
    # accumulation and BN math stay f32, so only a loose tolerance is needed.
    out_bf16 = conv_block_forward(x, conv_weight, gamma, beta, kernel_size=K,
                                  compute_dtype=jnp.bfloat16)
    out_bf16 = jax.block_until_ready(out_bf16)
    assert out_bf16.shape == (N, Cout, H, W)
    assert jnp.allclose(out_bf16, ref, atol=1e-1, rtol=1e-1), "bf16 mismatch vs reference"

    print("KERNEL_OK")
</pallas_src>

<mosaic_0001>
module attributes {stable_mosaic.version = 11 : i64} {
  func.func @conv_stats_kernel(%arg0: i32, %arg1: i32, %arg2: i32, %arg3: memref<1x18x18x4xf32, #tpu.memory_space<vmem>>, %arg4: memref<9x4x8xf32, #tpu.memory_space<vmem>>, %arg5: memref<1x128x8xf32, #tpu.memory_space<vmem>>, %arg6: memref<1x1x8x8xf32, #tpu.memory_space<vmem>>, %arg7: memref<1x1x8x8xf32, #tpu.memory_space<vmem>>) attributes {dimension_semantics = [#tpu.dimension_semantics<parallel>, #tpu.dimension_semantics<parallel>, #tpu.dimension_semantics<arbitrary>], iteration_bounds = array<i64: 2, 2, 1>, scalar_prefetch = 0 : i64, scratch_operands = 0 : i64, tpu.core_type = #tpu.core_type<tc>, window_params = [{transform_indices = @transform_0, window_bounds = array<i64: 1, 18, 18, 4>}, {pipeline_mode = #tpu.pipeline_mode<synchronous>, transform_indices = @transform_1, window_bounds = array<i64: 9, 4, 8>}, {transform_indices = @transform_2, window_bounds = array<i64: 1, 128, 8>}, {transform_indices = @transform_3, window_bounds = array<i64: 1, 1, 8, 8>}, {transform_indices = @transform_4, window_bounds = array<i64: 1, 1, 8, 8>}]} {
    %c1_i32 = arith.constant 1 : i32
    %0 = arith.muli %arg0, %c1_i32 : i32
    %1 = arith.addi %0, %arg2 : i32
    %c8_i32 = arith.constant 8 : i32
    %2 = arith.muli %1, %c8_i32 : i32
    %cst = arith.constant 0.000000e+00 : f32
    %3 = vector.broadcast %cst : f32 to vector<128x8xf32>
    %c0_i32 = arith.constant 0 : i32
    %4 = arith.addi %2, %c0_i32 : i32
    %c0 = arith.constant 0 : index
    %5 = arith.index_cast %4 : i32 to index
    %c0_0 = arith.constant 0 : index
    %c0_1 = arith.constant 0 : index
    %6 = vector.load %arg3[%c0, %5, %c0_0, %c0_1] : memref<1x18x18x4xf32, #tpu.memory_space<vmem>>, vector<1x8x18x4xf32>
    %7 = vector.shape_cast %6 : vector<1x8x18x4xf32> to vector<8x18x4xf32>
    %8 = vector.extract_strided_slice %7 {offsets = [0, 0, 0], sizes = [8, 16, 4], strides = [1, 1, 1]} : vector<8x18x4xf32> to vector<8x16x4xf32>
    %9 = vector.shape_cast %8 : vector<8x16x4xf32> to vector<128x4xf32>
    %c0_2 = arith.constant 0 : index
    %c0_3 = arith.constant 0 : index
    %c0_4 = arith.constant 0 : index
    %10 = vector.load %arg4[%c0_2, %c0_3, %c0_4] : memref<9x4x8xf32, #tpu.memory_space<vmem>>, vector<1x4x8xf32>
    %11 = vector.shape_cast %10 : vector<1x4x8xf32> to vector<4x8xf32>
    %cst_5 = arith.constant dense<0.000000e+00> : vector<128x8xf32>
    %12 = tpu.matmul %9, %11, %cst_5 {dimension_numbers = #tpu.dot_dimension_numbers<[1], [0], [0], [1], [0, 0, 1, 1], [], []>} : vector<128x4xf32>, vector<4x8xf32>, vector<128x8xf32> -> vector<128x8xf32>
    %13 = arith.addf %3, %12 : vector<128x8xf32>
    %14 = vector.extract_strided_slice %7 {offsets = [0, 1, 0], sizes = [8, 16, 4], strides = [1, 1, 1]} : vector<8x18x4xf32> to vector<8x16x4xf32>
    %15 = vector.shape_cast %14 : vector<8x16x4xf32> to vector<128x4xf32>
    %c1 = arith.constant 1 : index
    %c0_6 = arith.constant 0 : index
    %c0_7 = arith.constant 0 : index
    %16 = vector.load %arg4[%c1, %c0_6, %c0_7] : memref<9x4x8xf32, #tpu.memory_space<vmem>>, vector<1x4x8xf32>
    %17 = vector.shape_cast %16 : vector<1x4x8xf32> to vector<4x8xf32>
    %cst_8 = arith.constant dense<0.000000e+00> : vector<128x8xf32>
    %18 = tpu.matmul %15, %17, %cst_8 {dimension_numbers = #tpu.dot_dimension_numbers<[1], [0], [0], [1], [0, 0, 1, 1], [], []>} : vector<128x4xf32>, vector<4x8xf32>, vector<128x8xf32> -> vector<128x8xf32>
    %19 = arith.addf %13, %18 : vector<128x8xf32>
    %20 = vector.extract_strided_slice %7 {offsets = [0, 2, 0], sizes = [8, 16, 4], strides = [1, 1, 1]} : vector<8x18x4xf32> to vector<8x16x4xf32>
    %21 = vector.shape_cast %20 : vector<8x16x4xf32> to vector<128x4xf32>
    %c2 = arith.constant 2 : index
    %c0_9 = arith.constant 0 : index
    %c0_10 = arith.constant 0 : index
    %22 = vector.load %arg4[%c2, %c0_9, %c0_10] : memref<9x4x8xf32, #tpu.memory_space<vmem>>, vector<1x4x8xf32>
    %23 = vector.shape_cast %22 : vector<1x4x8xf32> to vector<4x8xf32>
    %cst_11 = arith.constant dense<0.000000e+00> : vector<128x8xf32>
    %24 = tpu.matmul %21, %23, %cst_11 {dimension_numbers = #tpu.dot_dimension_numbers<[1], [0], [0], [1], [0, 0, 1, 1], [], []>} : vector<128x4xf32>, vector<4x8xf32>, vector<128x8xf32> -> vector<128x8xf32>
    %25 = arith.addf %19, %24 : vector<128x8xf32>
    %c1_i32_12 = arith.constant 1 : i32
    %26 = arith.addi %2, %c1_i32_12 : i32
    %c0_13 = arith.constant 0 : index
    %27 = arith.index_cast %26 : i32 to index
    %c0_14 = arith.constant 0 : index
    %c0_15 = arith.constant 0 : index
    %28 = vector.load %arg3[%c0_13, %27, %c0_14, %c0_15] : memref<1x18x18x4xf32, #tpu.memory_space<vmem>>, vector<1x8x18x4xf32>
    %29 = vector.shape_cast %28 : vector<1x8x18x4xf32> to vector<8x18x4xf32>
    %30 = vector.extract_strided_slice %29 {offsets = [0, 0, 0], sizes = [8, 16, 4], strides = [1, 1, 1]} : vector<8x18x4xf32> to vector<8x16x4xf32>
    %31 = vector.shape_cast %30 : vector<8x16x4xf32> to vector<128x4xf32>
    %c3 = arith.constant 3 : index
    %c0_16 = arith.constant 0 : index
    %c0_17 = arith.constant 0 : index
    %32 = vector.load %arg4[%c3, %c0_16, %c0_17] : memref<9x4x8xf32, #tpu.memory_space<vmem>>, vector<1x4x8xf32>
    %33 = vector.shape_cast %32 : vector<1x4x8xf32> to vector<4x8xf32>
    %cst_18 = arith.constant dense<0.000000e+00> : vector<128x8xf32>
    %34 = tpu.matmul %31, %33, %cst_18 {dimension_numbers = #tpu.dot_dimension_numbers<[1], [0], [0], [1], [0, 0, 1, 1], [], []>} : vector<128x4xf32>, vector<4x8xf32>, vector<128x8xf32> -> vector<128x8xf32>
    %35 = arith.addf %25, %34 : vector<128x8xf32>
    %36 = vector.extract_strided_slice %29 {offsets = [0, 1, 0], sizes = [8, 16, 4], strides = [1, 1, 1]} : vector<8x18x4xf32> to vector<8x16x4xf32>
    %37 = vector.shape_cast %36 : vector<8x16x4xf32> to vector<128x4xf32>
    %c4 = arith.constant 4 : index
    %c0_19 = arith.constant 0 : index
    %c0_20 = arith.constant 0 : index
    %38 = vector.load %arg4[%c4, %c0_19, %c0_20] : memref<9x4x8xf32, #tpu.memory_space<vmem>>, vector<1x4x8xf32>
    %39 = vector.shape_cast %38 : vector<1x4x8xf32> to vector<4x8xf32>
    %cst_21 = arith.constant dense<0.000000e+00> : vector<128x8xf32>
    %40 = tpu.matmul %37, %39, %cst_21 {dimension_numbers = #tpu.dot_dimension_numbers<[1], [0], [0], [1], [0, 0, 1, 1], [], []>} : vector<128x4xf32>, vector<4x8xf32>, vector<128x8xf32> -> vector<128x8xf32>
    %41 = arith.addf %35, %40 : vector<128x8xf32>
    %42 = vector.extract_strided_slice %29 {offsets = [0, 2, 0], sizes = [8, 16, 4], strides = [1, 1, 1]} : vector<8x18x4xf32> to vector<8x16x4xf32>
    %43 = vector.shape_cast %42 : vector<8x16x4xf32> to vector<128x4xf32>
    %c5 = arith.constant 5 : index
    %c0_22 = arith.constant 0 : index
    %c0_23 = arith.constant 0 : index
    %44 = vector.load %arg4[%c5, %c0_22, %c0_23] : memref<9x4x8xf32, #tpu.memory_space<vmem>>, vector<1x4x8xf32>
    %45 = vector.shape_cast %44 : vector<1x4x8xf32> to vector<4x8xf32>
    %cst_24 = arith.constant dense<0.000000e+00> : vector<128x8xf32>
    %46 = tpu.matmul %43, %45, %cst_24 {dimension_numbers = #tpu.dot_dimension_numbers<[1], [0], [0], [1], [0, 0, 1, 1], [], []>} : vector<128x4xf32>, vector<4x8xf32>, vector<128x8xf32> -> vector<128x8xf32>
    %47 = arith.addf %41, %46 : vector<128x8xf32>
    %c2_i32 = arith.constant 2 : i32
    %48 = arith.addi %2, %c2_i32 : i32
    %c0_25 = arith.constant 0 : index
    %49 = arith.index_cast %48 : i32 to index
    %c0_26 = arith.constant 0 : index
    %c0_27 = arith.constant 0 : index
    %50 = vector.load %arg3[%c0_25, %49, %c0_26, %c0_27] : memref<1x18x18x4xf32, #tpu.memory_space<vmem>>, vector<1x8x18x4xf32>
    %51 = vector.shape_cast %50 : vector<1x8x18x4xf32> to vector<8x18x4xf32>
    %52 = vector.extract_strided_slice %51 {offsets = [0, 0, 0], sizes = [8, 16, 4], strides = [1, 1, 1]} : vector<8x18x4xf32> to vector<8x16x4xf32>
    %53 = vector.shape_cast %52 : vector<8x16x4xf32> to vector<128x4xf32>
    %c6 = arith.constant 6 : index
    %c0_28 = arith.constant 0 : index
    %c0_29 = arith.constant 0 : index
    %54 = vector.load %arg4[%c6, %c0_28, %c0_29] : memref<9x4x8xf32, #tpu.memory_space<vmem>>, vector<1x4x8xf32>
    %55 = vector.shape_cast %54 : vector<1x4x8xf32> to vector<4x8xf32>
    %cst_30 = arith.constant dense<0.000000e+00> : vector<128x8xf32>
    %56 = tpu.matmul %53, %55, %cst_30 {dimension_numbers = #tpu.dot_dimension_numbers<[1], [0], [0], [1], [0, 0, 1, 1], [], []>} : vector<128x4xf32>, vector<4x8xf32>, vector<128x8xf32> -> vector<128x8xf32>
    %57 = arith.addf %47, %56 : vector<128x8xf32>
    %58 = vector.extract_strided_slice %51 {offsets = [0, 1, 0], sizes = [8, 16, 4], strides = [1, 1, 1]} : vector<8x18x4xf32> to vector<8x16x4xf32>
    %59 = vector.shape_cast %58 : vector<8x16x4xf32> to vector<128x4xf32>
    %c7 = arith.constant 7 : index
    %c0_31 = arith.constant 0 : index
    %c0_32 = arith.constant 0 : index
    %60 = vector.load %arg4[%c7, %c0_31, %c0_32] : memref<9x4x8xf32, #tpu.memory_space<vmem>>, vector<1x4x8xf32>
    %61 = vector.shape_cast %60 : vector<1x4x8xf32> to vector<4x8xf32>
    %cst_33 = arith.constant dense<0.000000e+00> : vector<128x8xf32>
    %62 = tpu.matmul %59, %61, %cst_33 {dimension_numbers = #tpu.dot_dimension_numbers<[1], [0], [0], [1], [0, 0, 1, 1], [], []>} : vector<128x4xf32>, vector<4x8xf32>, vector<128x8xf32> -> vector<128x8xf32>
    %63 = arith.addf %57, %62 : vector<128x8xf32>
    %64 = vector.extract_strided_slice %51 {offsets = [0, 2, 0], sizes = [8, 16, 4], strides = [1, 1, 1]} : vector<8x18x4xf32> to vector<8x16x4xf32>
    %65 = vector.shape_cast %64 : vector<8x16x4xf32> to vector<128x4xf32>
    %c8 = arith.constant 8 : index
    %c0_34 = arith.constant 0 : index
    %c0_35 = arith.constant 0 : index
    %66 = vector.load %arg4[%c8, %c0_34, %c0_35] : memref<9x4x8xf32, #tpu.memory_space<vmem>>, vector<1x4x8xf32>
    %67 = vector.shape_cast %66 : vector<1x4x8xf32> to vector<4x8xf32>
    %cst_36 = arith.constant dense<0.000000e+00> : vector<128x8xf32>
    %68 = tpu.matmul %65, %67, %cst_36 {dimension_numbers = #tpu.dot_dimension_numbers<[1], [0], [0], [1], [0, 0, 1, 1], [], []>} : vector<128x4xf32>, vector<4x8xf32>, vector<128x8xf32> -> vector<128x8xf32>
    %69 = arith.addf %63, %68 : vector<128x8xf32>
    %c0_37 = arith.constant 0 : index
    %c0_38 = arith.constant 0 : index
    %c0_39 = arith.constant 0 : index
    %70 = vector.load %arg5[%c0_37, %c0_38, %c0_39] : memref<1x128x8xf32, #tpu.memory_space<vmem>>, vector<1x128x8xf32>
    %71 = vector.shape_cast %70 : vector<1x128x8xf32> to vector<128x8xf32>
    %72 = vector.shape_cast %69 : vector<128x8xf32> to vector<1x128x8xf32>
    tpu.vector_store %arg5[%c0_37, %c0_38, %c0_39], %72 {strides = array<i32>} : memref<1x128x8xf32, #tpu.memory_space<vmem>>, vector<1x128x8xf32>,
    %c0_i32_40 = arith.constant 0 : i32
    %73 = arith.cmpi eq, %arg2, %c0_i32_40 : i32
    %74 = arith.extui %73 : i1 to i32
    %c0_i32_41 = arith.constant 0 : i32
    %75 = arith.cmpi ne, %74, %c0_i32_41 : i32
    scf.if %75 {
      %cst_60 = arith.constant 0.000000e+00 : f32
      %93 = vector.broadcast %cst_60 : f32 to vector<1x1x8x8xf32>
      %c0_61 = arith.constant 0 : index
      %c0_62 = arith.constant 0 : index
      %c0_63 = arith.constant 0 : index
      %c0_64 = arith.constant 0 : index
      %94 = vector.load %arg6[%c0_61, %c0_62, %c0_63, %c0_64] : memref<1x1x8x8xf32, #tpu.memory_space<vmem>>, vector<1x1x8x8xf32>
      tpu.vector_store %arg6[%c0_61, %c0_62, %c0_63, %c0_64], %93 {strides = array<i32>} : memref<1x1x8x8xf32, #tpu.memory_space<vmem>>, vector<1x1x8x8xf32>,
      %cst_65 = arith.constant 0.000000e+00 : f32
      %95 = vector.broadcast %cst_65 : f32 to vector<1x1x8x8xf32>
      %c0_66 = arith.constant 0 : index
      %c0_67 = arith.constant 0 : index
      %c0_68 = arith.constant 0 : index
      %c0_69 = arith.constant 0 : index
      %96 = vector.load %arg7[%c0_66, %c0_67, %c0_68, %c0_69] : memref<1x1x8x8xf32, #tpu.memory_space<vmem>>, vector<1x1x8x8xf32>
      tpu.vector_store %arg7[%c0_66, %c0_67, %c0_68, %c0_69], %95 {strides = array<i32>} : memref<1x1x8x8xf32, #tpu.memory_space<vmem>>, vector<1x1x8x8xf32>,
    } else {
    }
    %c0_42 = arith.constant 0 : index
    %c0_43 = arith.constant 0 : index
    %c0_44 = arith.constant 0 : index
    %c0_45 = arith.constant 0 : index
    %76 = vector.load %arg6[%c0_42, %c0_43, %c0_44, %c0_45] : memref<1x1x8x8xf32, #tpu.memory_space<vmem>>, vector<1x1x1x8xf32>
    %77 = vector.shape_cast %76 : vector<1x1x1x8xf32> to vector<1x8xf32>
    %cst_46 = arith.constant dense<0.000000e+00> : vector<8xf32>
    %78 = vector.multi_reduction <add>, %69, %cst_46 [0] : vector<128x8xf32> to vector<8xf32>
    %79 = vector.shape_cast %78 : vector<8xf32> to vector<1x8xf32>
    %80 = arith.addf %77, %79 : vector<1x8xf32>
    %c0_47 = arith.constant 0 : index
    %c0_48 = arith.constant 0 : index
    %c0_49 = arith.constant 0 : index
    %c0_50 = arith.constant 0 : index
    %81 = vector.load %arg6[%c0_47, %c0_48, %c0_49, %c0_50] : memref<1x1x8x8xf32, #tpu.memory_space<vmem>>, vector<1x1x1x8xf32>
    %82 = vector.shape_cast %81 : vector<1x1x1x8xf32> to vector<1x8xf32>
    %83 = vector.shape_cast %80 : vector<1x8xf32> to vector<1x1x1x8xf32>
    tpu.vector_store %arg6[%c0_47, %c0_48, %c0_49, %c0_50], %83 {strides = array<i32>} : memref<1x1x8x8xf32, #tpu.memory_space<vmem>>, vector<1x1x1x8xf32>,
    %c0_51 = arith.constant 0 : index
    %c0_52 = arith.constant 0 : index
    %c0_53 = arith.constant 0 : index
    %c0_54 = arith.constant 0 : index
    %84 = vector.load %arg7[%c0_51, %c0_52, %c0_53, %c0_54] : memref<1x1x8x8xf32, #tpu.memory_space<vmem>>, vector<1x1x1x8xf32>
    %85 = vector.shape_cast %84 : vector<1x1x1x8xf32> to vector<1x8xf32>
    %86 = arith.mulf %69, %69 : vector<128x8xf32>
    %cst_55 = arith.constant dense<0.000000e+00> : vector<8xf32>
    %87 = vector.multi_reduction <add>, %86, %cst_55 [0] : vector<128x8xf32> to vector<8xf32>
    %88 = vector.shape_cast %87 : vector<8xf32> to vector<1x8xf32>
    %89 = arith.addf %85, %88 : vector<1x8xf32>
    %c0_56 = arith.constant 0 : index
    %c0_57 = arith.constant 0 : index
    %c0_58 = arith.constant 0 : index
    %c0_59 = arith.constant 0 : index
    %90 = vector.load %arg7[%c0_56, %c0_57, %c0_58, %c0_59] : memref<1x1x8x8xf32, #tpu.memory_space<vmem>>, vector<1x1x1x8xf32>
    %91 = vector.shape_cast %90 : vector<1x1x1x8xf32> to vector<1x8xf32>
    %92 = vector.shape_cast %89 : vector<1x8xf32> to vector<1x1x1x8xf32>
    tpu.vector_store %arg7[%c0_56, %c0_57, %c0_58, %c0_59], %92 {strides = array<i32>} : memref<1x1x8x8xf32, #tpu.memory_space<vmem>>, vector<1x1x1x8xf32>,
    return
  }
  func.func @transform_0(%arg0: i32, %arg1: i32, %arg2: i32) -> (i32, i32, i32, i32) {
    %c0_i32 = arith.constant 0 : i32
    %c0_i32_0 = arith.constant 0 : i32
    %c0_i32_1 = arith.constant 0 : i32
    %c0_i32_2 = arith.constant 0 : i32
    return %arg1, %c0_i32, %c0_i32_0, %c0_i32_1 : i32, i32, i32, i32
  }
  func.func @transform_1(%arg0: i32, %arg1: i32, %arg2: i32) -> (i32, i32, i32) {
    %c0_i32 = arith.constant 0 : i32
    %c0_i32_0 = arith.constant 0 : i32
    %c0_i32_1 = arith.constant 0 : i32
    %c0_i32_2 = arith.constant 0 : i32
    return %c0_i32, %c0_i32_0, %c0_i32_1 : i32, i32, i32
  }
  func.func @transform_2(%arg0: i32, %arg1: i32, %arg2: i32) -> (i32, i32, i32) {
    %c1_i32 = arith.constant 1 : i32
    %0 = arith.muli %arg0, %c1_i32 : i32
    %1 = arith.addi %0, %arg2 : i32
    %c0_i32 = arith.constant 0 : i32
    %c0_i32_0 = arith.constant 0 : i32
    return %arg1, %1, %c0_i32 : i32, i32, i32
  }
  func.func @transform_3(%arg0: i32, %arg1: i32, %arg2: i32) -> (i32, i32, i32, i32) {
    %c0_i32 = arith.constant 0 : i32
    %c0_i32_0 = arith.constant 0 : i32
    %c0_i32_1 = arith.constant 0 : i32
    return %arg0, %arg1, %c0_i32, %c0_i32_0 : i32, i32, i32, i32
  }
  func.func @transform_4(%arg0: i32, %arg1: i32, %arg2: i32) -> (i32, i32, i32, i32) {
    %c0_i32 = arith.constant 0 : i32
    %c0_i32_0 = arith.constant 0 : i32
    %c0_i32_1 = arith.constant 0 : i32
    return %arg0, %arg1, %c0_i32, %c0_i32_0 : i32, i32, i32, i32
  }
}

module attributes {stable_mosaic.version = 11 : i64} {
  func.func @bn_relu_kernel(%arg0: i32, %arg1: i32, %arg2: memref<1x128x8xf32, #tpu.memory_space<vmem>>, %arg3: memref<1x8xf32, #tpu.memory_space<vmem>>, %arg4: memref<1x8xf32, #tpu.memory_space<vmem>>, %arg5: memref<1x8x128xf32, #tpu.memory_space<vmem>>) attributes {dimension_semantics = [#tpu.dimension_semantics<parallel>, #tpu.dimension_semantics<parallel>], iteration_bounds = array<i64: 2, 2>, scalar_prefetch = 0 : i64, scratch_operands = 0 : i64, tpu.core_type = #tpu.core_type<tc>, window_params = [{transform_indices = @transform_0, window_bounds = array<i64: 1, 128, 8>}, {pipeline_mode = #tpu.pipeline_mode<synchronous>, transform_indices = @transform_1, window_bounds = array<i64: 1, 8>}, {pipeline_mode = #tpu.pipeline_mode<synchronous>, transform_indices = @transform_2, window_bounds = array<i64: 1, 8>}, {transform_indices = @transform_3, window_bounds = array<i64: 1, 8, 128>}]} {
    %c0 = arith.constant 0 : index
    %c0_0 = arith.constant 0 : index
    %c0_1 = arith.constant 0 : index
    %0 = vector.load %arg2[%c0, %c0_0, %c0_1] : memref<1x128x8xf32, #tpu.memory_space<vmem>>, vector<1x128x8xf32>
    %1 = vector.shape_cast %0 : vector<1x128x8xf32> to vector<128x8xf32>
    %c0_2 = arith.constant 0 : index
    %c0_3 = arith.constant 0 : index
    %2 = vector.load %arg3[%c0_2, %c0_3] : memref<1x8xf32, #tpu.memory_space<vmem>>, vector<1x8xf32>
    %3 = vector.broadcast %2 : vector<1x8xf32> to vector<128x8xf32>
    %4 = arith.mulf %1, %3 : vector<128x8xf32>
    %c0_4 = arith.constant 0 : index
    %c0_5 = arith.constant 0 : index
    %5 = vector.load %arg4[%c0_4, %c0_5] : memref<1x8xf32, #tpu.memory_space<vmem>>, vector<1x8xf32>
    %6 = vector.broadcast %5 : vector<1x8xf32> to vector<128x8xf32>
    %7 = arith.addf %4, %6 : vector<128x8xf32>
    %cst = arith.constant 0.000000e+00 : f32
    %8 = vector.broadcast %cst : f32 to vector<128x8xf32>
    %9 = arith.maximumf %7, %8 : vector<128x8xf32>
    %10 = tpu.transpose %9, [1, 0] : vector<128x8xf32> -> vector<8x128xf32>
    %c0_6 = arith.constant 0 : index
    %c0_7 = arith.constant 0 : index
    %c0_8 = arith.constant 0 : index
    %11 = vector.load %arg5[%c0_6, %c0_7, %c0_8] : memref<1x8x128xf32, #tpu.memory_space<vmem>>, vector<1x8x128xf32>
    %12 = vector.shape_cast %11 : vector<1x8x128xf32> to vector<8x128xf32>
    %13 = vector.shape_cast %10 : vector<8x128xf32> to vector<1x8x128xf32>
    tpu.vector_store %arg5[%c0_6, %c0_7, %c0_8], %13 {strides = array<i32>} : memref<1x8x128xf32, #tpu.memory_space<vmem>>, vector<1x8x128xf32>,
    return
  }
  func.func @transform_0(%arg0: i32, %arg1: i32) -> (i32, i32, i32) {
    %c0_i32 = arith.constant 0 : i32
    %c0_i32_0 = arith.constant 0 : i32
    return %arg0, %arg1, %c0_i32 : i32, i32, i32
  }
  func.func @transform_1(%arg0: i32, %arg1: i32) -> (i32, i32) {
    %c0_i32 = arith.constant 0 : i32
    %c0_i32_0 = arith.constant 0 : i32
    %c0_i32_1 = arith.constant 0 : i32
    return %c0_i32, %c0_i32_0 : i32, i32
  }
  func.func @transform_2(%arg0: i32, %arg1: i32) -> (i32, i32) {
    %c0_i32 = arith.constant 0 : i32
    %c0_i32_0 = arith.constant 0 : i32
    %c0_i32_1 = arith.constant 0 : i32
    return %c0_i32, %c0_i32_0 : i32, i32
  }
  func.func @transform_3(%arg0: i32, %arg1: i32) -> (i32, i32, i32) {
    %c0_i32 = arith.constant 0 : i32
    %c0_i32_0 = arith.constant 0 : i32
    return %arg0, %c0_i32, %arg1 : i32, i32, i32
  }
}

</mosaic_0001>

<bundles_post_ra>
// kernel: conv_block_forward.3
= control target key start
LH: loop header
LB: loop body
LE: loop exit
PB: predicated region body
PF: predicated region fallthrough
CT: control target
= control target key end

     0   :  { %s518_s12 = smov 0   ;;  %s520_s13 = smov 0   ;;  %s638_s0 = inlined_call_operand.vmem [shape: f32[2,256,8], index: 0, kind: input, shape index: {}]   ;;  %s639_s1 = inlined_call_operand.vmem [shape: f32[1,8], index: 1, kind: input, shape index: {}]   ;;  %s640_s2 = inlined_call_operand.vmem [shape: f32[1,8], index: 2, kind: input, shape index: {}]   ;;  %s641_s3 = inlined_call_operand.vmem [shape: f32[2,8,256], index: 3, kind: output, shape index: {}]  }
   0x1   :  { %s522_s14 = smov 0   ;;  %s524_s15 = smov 0  }
   0x2   :  { %s526_s16 = smov 0  }
   0x3 LB: > { %s22_s17 = sadd.s32 1, %s488_s14  ;;  %s25_s18 = sadd.s32 1, %s492_s15  ;;  %s496_s16 = sphi %s526_s16, %s13_s16   ;;  %s492_s15 = sphi %s524_s15, %s645_s15   ;;  %s488_s14 = sphi %s522_s14, %s644_s14   ;;  %s484_s13 = sphi %s520_s13, %s643_s13   ;;  %s480_s12 = sphi %s518_s12, %s642_s12  }
   0x4   : > { %p23_p0 = scmp.ge.s32.totalorder %s22_s17, 2  ;;  %p408_p1 = scmp.ge.s32.totalorder %s496_s16, 1 }
   0x5   : > { %p158_p2 = scmp.lt.s32.totalorder %s496_s16, 5 }
   0x6   : > { %s647_s17 = smov (%p23_p0, %s22_s17), 0  ;;  %s649_s18 = smov (!%p23_p0, %s25_s18), %s492_s15 }
   0x7   : > { %p159_p3 = pnand %p408_p1, %p158_p2  ;;  %p27_p4 = scmp.ge.s32.totalorder %s649_s18, 2 }
   0x8   : > { %s409_s19 = sshll.u32 (!%p159_p3), %s480_s12, 4  ;;  %p190_p5 = scmp.lt.s32.totalorder (!%p159_p3), %s484_s13, 1 }
   0x9   : > { %s651_s18 = smov (%p27_p4, %s649_s18), 0  ;;  %162 = sbr.rel (%p159_p3) target bundleno = 152 (0x98), region = 32 }
   0xa   : > { %p192_p6 = scmp.lt.s32.totalorder (!%p159_p3), %s409_s19, 31  ;;  %p201_p7 = scmp.lt.s32.totalorder (!%p159_p3), %s480_s12, 1 }
   0xe   : > { %s653_s13 = smov (!%p190_p5, %s484_s13), 1  ;;  %s655_s19 = smov (!%p192_p6, %s409_s19), 31  ;;  %v557_v0 = vld [vmem:[%s639_s1] ss:$0 sm:$0xff] }
   0xf   : > { %s410_s20 = sshll.u32 %s653_s13, 5  ;;  %v567_v1 = vld [vmem:[%s640_s2] ss:$0 sm:$0xff]  ;;  %s657_s12 = smov (!%p201_p7, %s480_s12), 1 }
  0x10   : > { %s195_s21 = sadd.s32 %s410_s20, %s655_s19  ;;  %s412_s30 = sshll.u32 %s653_s13, 1 }
  0x11   : > { %s411_s22 = sshll.u32 %s195_s21, 3  ;;  %s204_s4 = sadd.s32 %s412_s30, %s657_s12 }
  0x12   : > { %s562_s27 = scalar_lea.vmem %s638_s0, %s411_s22  ;;  %s413_s5 = sshll.u32 %s204_s4, 3 }
  0x13   : > { %v207_v2 = vld [vmem:[%s562_s27] sm:$0xff]  ;;  %v208_v3 = vld [vmem:[%s562_s27 + $0x8] sm:$0xff]  ;;  %v209_v4 = vld [vmem:[%s562_s27 + $0x10] sm:$0xff]  ;;  %s206_s8 = scalar_lea.vmem %s641_s3, %s413_s5 }
  0x14   : > { %v230_v5 = vmul.f32 %v557_v0, %v207_v2  ;;  %v231_v6 = vmul.f32 %v557_v0, %v208_v3  ;;  %v232_v9 = vmul.f32 %v557_v0, %v209_v4  ;;  %v210_v10 = vld [vmem:[%s562_s27 + $0x18] sm:$0xff]  ;;  %v211_v15 = vld [vmem:[%s562_s27 + $0x20] sm:$0xff]  ;;  %v212_v19 = vld [vmem:[%s562_s27 + $0x28] sm:$0xff] }
  0x15   : > { %v233_v14 = vmul.f32 %v557_v0, %v210_v10  ;;  %v234_v18 = vmul.f32 %v557_v0, %v211_v15  ;;  %v235_v22 = vmul.f32 %v557_v0, %v212_v19  ;;  %v213_v23 = vld [vmem:[%s562_s27 + $0x30] sm:$0xff]  ;;  %v214_v27 = vld [vmem:[%s562_s27 + $0x38] sm:$0xff]  ;;  %v215_v31 = vld [vmem:[%s562_s27 + $0x40] sm:$0xff] }
  0x16   : > { %v253_v7 = vadd.f32 %v567_v1, %v230_v5  ;;  %v254_v8 = vadd.f32 %v567_v1, %v231_v6  ;;  %v255_v13 = vadd.f32 %v567_v1, %v232_v9  ;;  %v236_v26 = vmul.f32 %v557_v0, %v213_v23  ;;  %v216_v35 = vld [vmem:[%s562_s27 + $0x48] sm:$0xff]  ;;  %v217_v39 = vld [vmem:[%s562_s27 + $0x50] sm:$0xff]  ;;  %v218_v43 = vld [vmem:[%s562_s27 + $0x58] sm:$0xff] }
  0x17   : > { %v256_v17 = vadd.f32 %v567_v1, %v233_v14  ;;  %v257_v21 = vadd.f32 %v567_v1, %v234_v18  ;;  %v258_v25 = vadd.f32 %v567_v1, %v235_v22  ;;  %v237_v30 = vmul.f32 %v557_v0, %v214_v27  ;;  %v219_v47 = vld [vmem:[%s562_s27 + $0x60] sm:$0xff]  ;;  %v220_v51 = vld [vmem:[%s562_s27 + $0x68] sm:$0xff]  ;;  %v221_v55 = vld [vmem:[%s562_s27 + $0x70] sm:$0xff] }
  0x18   : > { %v269_v11 = vmax.f32 %v253_v7, 0.0  ;;  %v270_v12 = vmax.f32 %v254_v8, 0.0  ;;  %v271_v16 = vmax.f32 %v255_v13, 0.0  ;;  %v259_v29 = vadd.f32 %v567_v1, %v236_v26  ;;  %v222_v59 = vld [vmem:[%s562_s27 + $0x78] sm:$0xff] }
  0x19   : > { %v272_v20 = vmax.f32 %v256_v17, 0.0  ;;  %v273_v24 = vmax.f32 %v257_v21, 0.0  ;;  %v274_v28 = vmax.f32 %v258_v25, 0.0  ;;  %v260_v33 = vadd.f32 %v567_v1, %v237_v30 }
  0x1a   : > { %285 = vxpose.xlu0.b32.start [1/16] (narrow) %v269_v11, 8  ;;  %v275_v32 = vmax.f32 %v259_v29, 0.0  ;;  %v238_v34 = vmul.f32 %v557_v0, %v215_v31  ;;  %v239_v38 = vmul.f32 %v557_v0, %v216_v35  ;;  %v240_v42 = vmul.f32 %v557_v0, %v217_v39 }
  0x1b   : > { %v276_v36 = vmax.f32 %v260_v33, 0.0  ;;  %v241_v46 = vmul.f32 %v557_v0, %v218_v43  ;;  %v242_v50 = vmul.f32 %v557_v0, %v219_v47  ;;  %v243_v54 = vmul.f32 %v557_v0, %v220_v51 }
  0x1c   : > { %v261_v37 = vadd.f32 %v567_v1, %v238_v34  ;;  %v262_v41 = vadd.f32 %v567_v1, %v239_v38  ;;  %v263_v45 = vadd.f32 %v567_v1, %v240_v42  ;;  %v244_v58 = vmul.f32 %v557_v0, %v221_v55 }
  0x1d   : > { %v264_v49 = vadd.f32 %v567_v1, %v241_v46  ;;  %v265_v53 = vadd.f32 %v567_v1, %v242_v50  ;;  %v266_v57 = vadd.f32 %v567_v1, %v243_v54  ;;  %v245_v62 = vmul.f32 %v557_v0, %v222_v59 }
  0x1e   : > { %286 = vxpose.xlu0.b32.cont [2/16] (narrow) %v270_v12, 8  ;;  %v277_v40 = vmax.f32 %v261_v37, 0.0  ;;  %v278_v44 = vmax.f32 %v262_v41, 0.0  ;;  %v279_v48 = vmax.f32 %v263_v45, 0.0  ;;  %v267_v61 = vadd.f32 %v567_v1, %v244_v58 }
  0x1f   : > { %v280_v52 = vmax.f32 %v264_v49, 0.0  ;;  %v281_v56 = vmax.f32 %v265_v53, 0.0  ;;  %v282_v60 = vmax.f32 %v266_v57, 0.0  ;;  %v268_v2 = vadd.f32 %v567_v1, %v245_v62 }
  0x20   : > { %v283_v63 = vmax.f32 %v267_v61, 0.0 }
  0x21   : > { %v284_v3 = vmax.f32 %v268_v2, 0.0 }
  0x22   : > { %287 = vxpose.xlu0.b32.cont [3/16] (narrow) %v271_v16, 8 }
  0x26   : > { %288 = vxpose.xlu0.b32.cont [4/16] (narrow) %v272_v20, 8 }
  0x2a   : > { %289 = vxpose.xlu0.b32.cont [5/16] (narrow) %v273_v24, 8 }
  0x2e   : > { %290 = vxpose.xlu0.b32.cont [6/16] (narrow) %v274_v28, 8 }
  0x32   : > { %291 = vxpose.xlu0.b32.cont [7/16] (narrow) %v275_v32, 8 }
  0x36   : > { %292 = vxpose.xlu0.b32.cont [8/16] (narrow) %v276_v36, 8 }
  0x3a   : > { %293 = vxpose.xlu0.b32.cont [9/16] (narrow) %v277_v40, 8 }
  0x3e   : > { %294 = vxpose.xlu0.b32.cont [10/16] (narrow) %v278_v44, 8 }
  0x42   : > { %295 = vxpose.xlu0.b32.cont [11/16] (narrow) %v279_v48, 8 }
  0x46   : > { %296 = vxpose.xlu0.b32.cont [12/16] (narrow) %v280_v52, 8 }
  0x4a   : > { %297 = vxpose.xlu0.b32.cont [13/16] (narrow) %v281_v56, 8 }
  0x4e   : > { %298 = vxpose.xlu0.b32.cont [14/16] (narrow) %v282_v60, 8 }
  0x52   : > { %299 = vxpose.xlu0.b32.cont [15/16] (narrow) %v283_v63, 8 }
  0x56   : > { %300 = vxpose.xlu0.b32.end [16/16] (narrow) %v284_v3, 8 }
  0x96   : > { %v301_v4 = vpop.trf.xlu0 }
  0x97   : > { %317 = vst [vmem:[%s206_s8] sm:$0xff] %v301_v4 }
  0x98 PF: > { %s13_s16 = sadd.s32 1, %s496_s16   ;;  %s642_s12 = smov %s488_s14 }
  0x99   : > { %p10_p8 = scmp.ge.s32.totalorder %s13_s16, 6   ;;  %s643_s13 = smov %s492_s15 }
  0x9a   : > { %s644_s14 = smov %s647_s17  ;;  %s645_s15 = smov %s651_s18 }
  0x9b   :  { %12 = sbr.rel (!%p10_p8) target bundleno = 3 (0x3), region = 62 }

// kernel: conv_block_forward.2
= control target key start
LH: loop header
LB: loop body
LE: loop exit
PB: predicated region body
PF: predicated region fallthrough
CT: control target
= control target key end

     0   :  { %s3465_s15 = smov 0   ;;  %s3467_s16 = smov 0   ;;  %s4600_s0 = inlined_call_operand.vmem [shape: f32[2,18,18,4], index: 0, kind: input, shape index: {}]   ;;  %s4601_s1 = inlined_call_operand.vmem [shape: f32[9,4,8], index: 1, kind: input, shape index: {}]   ;;  %s4602_s2 = inlined_call_operand.vmem [shape: f32[2,256,8], index: 2, kind: output, shape index: {0}]   ;;  %s4603_s3 = inlined_call_operand.vmem [shape: f32[2,2,8,8], index: 3, kind: output, shape index: {1}]   ;;  %s4604_s4 = inlined_call_operand.vmem [shape: f32[2,2,8,8], index: 4, kind: output, shape index: {2}]  }
   0x1   :  { %s3469_s17 = smov 0   ;;  %s3471_s18 = smov 0  }
   0x2   :  { %s3473_s19 = smov 0  }
   0x3 LB: > { %s30_s20 = sadd.s32 1, %s3429_s17  ;;  %s34_s21 = sadd.s32 1, %s3433_s18  ;;  %s3437_s19 = sphi %s3473_s19, %s15_s19   ;;  %s3433_s18 = sphi %s3471_s18, %s4719_s18   ;;  %s3429_s17 = sphi %s3469_s17, %s4718_s17   ;;  %s3425_s16 = sphi %s3467_s16, %s4717_s16   ;;  %s3421_s15 = sphi %s3465_s15, %s4716_s15  }
   0x4   : > { %p32_p0 = scmp.ge.s32.totalorder %s30_s20, 2  ;;  %p2742_p1 = scmp.ge.s32.totalorder %s3437_s19, 1 }
   0x5   : > { %p194_p2 = scmp.lt.s32.totalorder %s3437_s19, 5 }
   0x6   : > { %s4721_s20 = smov (%p32_p0, %s30_s20), 0  ;;  %s4723_s21 = smov (!%p32_p0, %s34_s21), %s3433_s18 }
   0x7   : > { %p195_p3 = pnand %p2742_p1, %p194_p2  ;;  %p36_p4 = scmp.ge.s32.totalorder %s4723_s21, 2 }
   0x9   : > { %s4725_s21 = smov (%p36_p4, %s4723_s21), 0  ;;  %198 = sbr.rel (%p195_p3) target bundleno = 388 (0x184), region = 28 }
   0xe   : > { %v2753_v0 = vld [vmem:[%s4601_s1 + $0x4] sm:$0xf]  ;;  %vm403_vm0 = vcmask 1043456   ;;  %p241_p5 = scmp.lt.s32.totalorder %s3421_s15, 1  ;;  %v302_v1 = vld [vmem:[%s4601_s1] sm:$0xf] }
   0xf   : > { %3355 = vmatprep.subr.msk.mxu1 %vm403_vm0, %v2753_v0  ;;  %3121 = vmatprep.subr.msk.mxu0 %vm403_vm0, %v2753_v0  ;;  %v2788_v2 = vld [vmem:[%s4601_s1 + $0x8] sm:$0xf]  ;;  %s2752_s28 = smul.u32 192, %s3425_s16  ;;  %vm327_vm1 = vcmask 1046528   ;;  %vm370_vm2 = vcmask 31744   ;;  %vm732_vm3 = vcmask 1045504  }
  0x10   : > { %3356 = vmatpush3.msk.msra.mxu1 %vm403_vm0, %v2753_v0  ;;  %3122 = vmatpush3.msk.msra.mxu0 %vm403_vm0, %v2753_v0  ;;  %s4727_s15 = smov (!%p241_p5, %s3421_s15), 1  ;;  %v3564_v21 = vld [vmem:[%s4601_s1 + $0xc] sm:$0xf]  ;;  %v3585_v28 = vld [vmem:[%s4601_s1 + $0x10] sm:$0xf]  ;;  %p258_p6 = scmp.lt.s32.totalorder %s3425_s16, 1 }
  0x11   : > { %3147 = vmatprep.subr.msk.mxu1 %vm403_vm0, %v302_v1  ;;  %3173 = vmatprep.subr.msk.mxu0 %vm403_vm0, %v2788_v2  ;;  %s3357_s29 = smul.u32 432, %s4727_s15  ;;  %vm2421_vm4 = vcmask 64512   ;;  %s2744_s11 = sshll.u32 %s3425_s16, 4  ;;  %vm2483_vm5 = vcmask 57344  }
  0x12   : > { %s259_s27 = scalar_select %p258_p6, %s3425_s16, 1 }
  0x13   : > { %s245_s6 = scalar_lea.vmem %s4600_s0, %s3357_s29  ;;  %p250_p7 = scmp.lt.s32.totalorder %s2744_s11, 31 }
  0x14   : > { %s3519_s7 = scalar_lea.vmem %s245_s6, %s2752_s28  ;;  %s2747_s28 = sshll.u32 %s259_s27, 1 }
  0x15   : > { %v3522_v3 = vld [vmem:[%s3519_s7] sm:$0xff]  ;;  %v3525_v4 = vld [vmem:[%s3519_s7 + $0x8] sm:$0xff]  ;;  %v3537_v10 = vld [vmem:[%s3519_s7 + $0x10] sm:$0x3]  ;;  %s263_s29 = sadd.s32 %s2747_s28, %s4727_s15  ;;  %s4729_s11 = smov (!%p250_p7, %s2744_s11), 31 }
  0x16   : > { %v3528_v5 = vld [vmem:[%s3519_s7 + $0x60] sm:$0xff]  ;;  %v328_v6 = vrot.slane %v3522_v3, 1  ;;  %v329_v7 = vrot.slane %v3525_v4, 1  ;;  %v3533_v8 = vld [vmem:[%s3519_s7 + $0x68] sm:$0xff]  ;;  %v331_v12 = vrot.slane %v3537_v10, 1  ;;  %v3547_v14 = vld [vmem:[%s3519_s7 + $0x18] sm:$0xff] }
  0x17   : > { %v348_v9 = vrot.slane %v3528_v5, 1  ;;  %v3540_v11 = vrot.slane %v3533_v8, 1  ;;  %v3544_v13 = vld [vmem:[%s3519_s7 + $0x70] sm:$0x3]  ;;  %v3552_v17 = vld [vmem:[%s3519_s7 + $0x20] sm:$0xff]  ;;  %v333_v18 = vrot.slane %v3547_v14, 1 }
  0x18   : > { %v330_v15 = vsel %vm327_vm1, %v328_v6, %v329_v7  ;;  %v351_v16 = vrot.slane %v3544_v13, 1  ;;  %v3556_v19 = vld [vmem:[%s3519_s7 + $0x78] sm:$0xff]  ;;  %v3559_v20 = vld [vmem:[%s3519_s7 + $0x80] sm:$0xff]  ;;  %v332_v23 = vsel %vm327_vm1, %v329_v7, %v331_v12  ;;  %v3573_v24 = vrot.slane %v3552_v17, 1  ;;  %v3577_v26 = vld [vmem:[%s3519_s7 + $0x28] sm:$0x3] }
  0x19   : > { %3123 = vmatprep.mubr.msk.f32.mxu0 %vm370_vm2, %v330_v15  ;;  %v3569_v22 = vsel %vm327_vm1, %v348_v9, %v3540_v11  ;;  %v353_v25 = vrot.slane %v3556_v19, 1  ;;  %v3580_v27 = vld [vmem:[%s3519_s7 + $0x88] sm:$0x3]  ;;  %v3593_v30 = vrot.slane %v3559_v20, 1  ;;  %v336_v31 = vrot.slane %v3577_v26, 1  ;;  %v3598_v33 = vld [vmem:[%s3519_s7 + $0x30] sm:$0xff] }
  0x1a   : > { %4628 = vst [vmem:[#allocation2_spill] sm:$0xff] %v3569_v22  ;;  %3135 = vmatprep.mubr.msk.f32.mxu1 %vm370_vm2, %v3569_v22  ;;  %3124 = vmatmul.mubr.msk.f32.vlgmr.msra.gmra.mxu0 %vm370_vm2, %v332_v23  ;;  %v352_v29 = vsel %vm327_vm1, %v3540_v11, %v351_v16  ;;  %v356_v32 = vrot.slane %v3580_v27, 1  ;;  %v3601_v34 = vld [vmem:[%s3519_s7 + $0x38] sm:$0xff]  ;;  %v3604_v35 = vld [vmem:[%s3519_s7 + $0x90] sm:$0xff]  ;;  %v3610_v36 = vsel %vm327_vm1, %v333_v18, %v3573_v24  ;;  %v338_v37 = vrot.slane %v3598_v33, 1  ;;  %v3641_v47 = vld [vmem:[%s3519_s7 + $0x48] sm:$0xff] }
  0x1b   : > { %3136 = vmatmul.mubr.msk.f32.vlgmr.msra.gmra.mxu1 %vm370_vm2, %v352_v29  ;;  %3174 = vmatpush3.msk.msra.mxu0 %vm403_vm0, %v2788_v2  ;;  %v3614_v38 = vrot.slane %v3601_v34, 1  ;;  %v3617_v39 = vld [vmem:[%s3519_s7 + $0x98] sm:$0xff]  ;;  %v358_v40 = vrot.slane %v3604_v35, 1  ;;  %v3621_v41 = vld [vmem:[%s3519_s7 + $0x40] sm:$0x3]  ;;  %v3628_v42 = vsel %vm327_vm1, %v353_v25, %v3593_v30  ;;  %v337_v43 = vsel %vm327_vm1, %v3573_v24, %v336_v31  ;;  %v3644_v48 = vld [vmem:[%s3519_s7 + $0x50] sm:$0xff] }
  0x1c   : > { %3148 = vmatpush3.msk.msra.mxu1 %vm403_vm0, %v302_v1  ;;  %3126 = vmatprep.mubr.msk.f32.mxu0 %vm370_vm2, %v3610_v36  ;;  %4629 = vst [vmem:[#allocation3_spill] sm:$0xff] %v3628_v42  ;;  %v357_v44 = vsel %vm327_vm1, %v3593_v30, %v356_v32  ;;  %v3635_v45 = vrot.slane %v3617_v39, 1  ;;  %v3638_v46 = vld [vmem:[%s3519_s7 + $0xa0] sm:$0x3]  ;;  %v341_v50 = vrot.slane %v3621_v41, 1  ;;  %v343_v52 = vrot.slane %v3641_v47, 1 }
  0x1d   : > { %3138 = vmatprep.mubr.msk.f32.mxu1 %vm370_vm2, %v3628_v42  ;;  %v3650_v49 = vsel %vm327_vm1, %v338_v37, %v3614_v38  ;;  %v361_v51 = vrot.slane %v3638_v46, 1  ;;  %v3656_v53 = vld [vmem:[%s3519_s7 + $0xa8] sm:$0xff]  ;;  %v3659_v54 = vld [vmem:[%s3519_s7 + $0xb0] sm:$0xff]  ;;  %3199 = vmatprep.subr.msk.mxu1 %vm403_vm0, %v3564_v21  ;;  %v3669_v56 = vrot.slane %v3644_v48, 1  ;;  %v289_v59 = vld [vmem:[%s3519_s7 + $0x58] sm:$0x3] }
  0x1e   : > { %3127 = vmatmul.mubr.msk.f32.gmra.mxu0 %vm370_vm2, %v337_v43  ;;  %v3666_v55 = vsel %vm327_vm1, %v358_v40, %v3635_v45  ;;  %v363_v57 = vrot.slane %v3656_v53, 1  ;;  %v3673_v58 = vrot.slane %v3659_v54, 1  ;;  %3225 = vmatprep.subr.msk.mxu0 %vm403_vm0, %v3585_v28  ;;  %v736_v60 = vrot.slane %v3537_v10, 2  ;;  %v3685_v63 = vld [vmem:[%s3519_s7 + $0xb8] sm:$0x3]  ;;  %s2748_s30 = sshll.u32 %s263_s29, 3 }
  0x1f   : > { %4630 = vst [vmem:[#allocation4_spill] sm:$0xff] %v3666_v55  ;;  %3139 = vmatmul.mubr.msk.f32.gmra.mxu1 %vm370_vm2, %v357_v44  ;;  %3129 = vmatprep.mubr.msk.f32.mxu0 %vm370_vm2, %v3650_v49  ;;  %v342_v61 = vsel %vm327_vm1, %v3614_v38, %v341_v50  ;;  %v346_v62 = vrot.slane %v289_v59, 1  ;;  %v733_v0 = vrot.slane %v3522_v3, 2  ;;  %v362_v1 = vsel %vm327_vm1, %v3635_v45, %v361_v51  ;;  %s4299_s10 = scalar_lea.vmem %s4604_s4, %s2748_s30  ;;  %s2745_s16 = sshll.u32 %s4727_s15, 5 }
  0x20   : > { %3141 = vmatprep.mubr.msk.f32.mxu1 %vm370_vm2, %v3666_v55  ;;  %v3694_v2 = vsel %vm327_vm1, %v343_v52, %v3669_v56  ;;  %v366_v6 = vrot.slane %v3685_v63, 1  ;;  %v734_v7 = vrot.slane %v3525_v4, 2  ;;  %v3700_v9 = vsel %vm327_vm1, %v363_v57, %v3673_v58  ;;  %v3744_v57 = vld [vmem:[%s3519_s7 + $0x88] sm:$0x3]  ;;  %s4445_s12 = sadd.s32 %s2745_s16, %s4729_s11 }
  0x21   : > { %4631 = vst [vmem:[#allocation5_spill] sm:$0xff] %v3700_v9  ;;  %v347_v10 = vsel %vm327_vm1, %v3669_v56, %v346_v62  ;;  %v738_v12 = vrot.slane %v3547_v14, 2  ;;  %v3716_v23 = vrot.slane %v3552_v17, 2  ;;  %v741_v25 = vrot.slane %v3577_v26, 2  ;;  %v3757_v62 = vld [vmem:[%s3519_s7 + $0xa0] sm:$0x3] }
  0x22   : > { %3130 = vmatmul.mubr.msk.f32.gmra.mxu0 %vm370_vm2, %v342_v61  ;;  %v367_v15 = vsel %vm327_vm1, %v3673_v58, %v366_v6  ;;  %v735_v16 = vsel %vm732_vm3, %v733_v0, %v734_v7  ;;  %v737_v18 = vsel %vm732_vm3, %v734_v7, %v736_v60  ;;  %v743_v29 = vrot.slane %v3598_v33, 2  ;;  %v3777_v6 = vld [vmem:[%s4601_s1 + $0x14] sm:$0xf]  ;;  %v3780_v7 = vld [vmem:[%s3519_s7 + $0xb8] sm:$0x3]  ;;  %s2746_s15 = sshll.u32 %s4445_s12, 3 }
  0x23   : > { %3142 = vmatmul.mubr.msk.f32.gmra.mxu1 %vm370_vm2, %v362_v1  ;;  %3132 = vmatprep.mubr.msk.f32.mxu0 %vm370_vm2, %v3694_v2  ;;  %4632 = vst [vmem:[#allocation6_spill] sm:$0xff] %v3716_v23  ;;  %v3721_v31 = vrot.slane %v3601_v34, 2  ;;  %v746_v32 = vrot.slane %v3621_v41, 2  ;;  %v748_v37 = vrot.slane %v3641_v47, 2  ;;  %v3727_v40 = vrot.slane %v3644_v48, 2  ;;  %s4481_s22 = scalar_lea.vmem %s4602_s2, %s2746_s15 }
  0x24   : > { %3144 = vmatprep.mubr.msk.f32.mxu1 %vm370_vm2, %v3700_v9  ;;  %v751_v43 = vrot.slane %v289_v59, 2  ;;  %v753_v44 = vrot.slane %v3528_v5, 2  ;;  %v3733_v26 = vrot.slane %v3533_v8, 2  ;;  %v756_v41 = vrot.slane %v3544_v13, 2 }
  0x25   : > { %v758_v50 = vrot.slane %v3556_v19, 2  ;;  %v3738_v51 = vrot.slane %v3559_v20, 2  ;;  %v761_v52 = vrot.slane %v3580_v27, 2  ;;  %v3748_v59 = vsel %vm732_vm3, %v738_v12, %v3716_v23 }
  0x26   : > { %3133 = vmatmul.mubr.msk.f32.gmra.mxu0 %vm370_vm2, %v347_v10  ;;  %4633 = vst [vmem:[#allocation7_spill] sm:$0xff] %v3748_v59  ;;  %v742_v13 = vsel %vm732_vm3, %v3716_v23, %v741_v25  ;;  %v763_v60 = vrot.slane %v3604_v35, 2  ;;  %v3754_v61 = vrot.slane %v3617_v39, 2  ;;  %v747_v27 = vsel %vm732_vm3, %v3721_v31, %v746_v32  ;;  %v3783_v10 = vld [vmem:[%s3519_s7 + $0xc0] sm:$0xff]  ;;  %v2831_v25 = vld [vmem:[%s3519_s7 + $0xd0] sm:$0x3] }
  0x27   : > { %3145 = vmatmul.mubr.msk.f32.gmra.mxu1 %vm370_vm2, %v367_v15  ;;  %3175 = vmatprep.mubr.msk.f32.mxu0 %vm370_vm2, %v735_v16  ;;  %v3768_v0 = vsel %vm732_vm3, %v748_v37, %v3727_v40  ;;  %v3772_v1 = vsel %vm732_vm3, %v3727_v40, %v751_v43  ;;  %4636 = vst [vmem:[#allocation10_spill] sm:$0xff] %v3783_v10  ;;  %v1248_v43 = vrot.slane %v3757_v62, 1  ;;  %v1255_v37 = vrot.slane %v3783_v10, 1  ;;  %v3849_v32 = vld [vmem:[%s3519_s7 + $0x70] sm:$0x3] }
  0x28   : > { %3149 = vmatprep.mubr.msk.f32.mxu1 %vm370_vm2, %v3522_v3  ;;  %v3762_v3 = vsel %vm732_vm3, %v743_v29, %v3721_v31  ;;  %4635 = vst [vmem:[#allocation9_spill] sm:$0xff] %v3768_v0  ;;  %v3791_v12 = vsel %vm732_vm3, %v753_v44, %v3733_v26  ;;  %v3795_v15 = vsel %vm732_vm3, %v3733_v26, %v756_v41  ;;  %v3831_v44 = vld [vmem:[%s3519_s7 + $0x40] sm:$0x3]  ;;  %v3834_v41 = vld [vmem:[%s3519_s7 + $0x58] sm:$0x3]  ;;  %4639 = vst [vmem:[#allocation13_spill] sm:$0xff] %v3849_v32 }
  0x29   : > { %4634 = vst [vmem:[#allocation8_spill] sm:$0xff] %v3762_v3  ;;  %v3799_v16 = vsel %vm732_vm3, %v758_v50, %v3738_v51  ;;  %v3817_v29 = vsel %vm732_vm3, %v3738_v51, %v761_v52  ;;  %v1253_v52 = vrot.slane %v3780_v7, 1  ;;  %v3853_v23 = vsel %vm327_vm1, %v3635_v45, %v1248_v43 }
  0x2a   : > { %3176 = vmatmul.mubr.msk.f32.vlgmr.msra.gmra.mxu0 %vm370_vm2, %v737_v18  ;;  %v3808_v18 = vld [vmem:[%s3519_s7 + $0xc8] sm:$0xff]  ;;  %4640 = vst [vmem:[#allocation14_spill] sm:$0xff] %v3853_v23  ;;  %v1466_v43 = vrot.slane %v3831_v44, 2  ;;  %v1471_v9 = vrot.slane %v3834_v41, 2  ;;  %v1476_v23 = vrot.slane %v3849_v32, 2  ;;  %v1493_v55 = vrot.slane %v3783_v10, 2 }
  0x2b   : > { %3150 = vmatmul.mubr.msk.f32.vlgmr.msra.gmra.mxu1 %vm370_vm2, %v3525_v4  ;;  %3226 = vmatpush3.msk.msra.mxu0 %vm403_vm0, %v3585_v28  ;;  %v3804_v4 = vld [vmem:[%s4601_s1 + $0x18] sm:$0xf]  ;;  %v1243_v28 = vrot.slane %v3744_v57, 1  ;;  %4637 = vst [vmem:[#allocation11_spill] sm:$0xff] %v3808_v18  ;;  %v2902_v32 = vld [vmem:[%s3519_s7 + $0xa0] sm:$0x3] }
  0x2c   : > { %3200 = vmatpush3.msk.msra.mxu1 %vm403_vm0, %v3564_v21  ;;  %3152 = vmatprep.mubr.msk.f32.mxu1 %vm370_vm2, %v3547_v14  ;;  %v3826_v21 = vsel %vm732_vm3, %v763_v60, %v3754_v61  ;;  %v3844_v60 = vrot.slane %v3659_v54, 2  ;;  %v3887_v42 = vsel %vm732_vm3, %v3727_v40, %v1471_v9  ;;  %v3891_v10 = vsel %vm732_vm3, %v3733_v26, %v1476_v23 }
  0x2d   : > { %3178 = vmatprep.mubr.msk.f32.mxu0 %vm370_vm2, %v3748_v59  ;;  %3251 = vmatprep.subr.msk.mxu1 %vm403_vm0, %v3777_v6  ;;  %v3838_v50 = vsel %vm327_vm1, %v3593_v30, %v1243_v28  ;;  %v3856_v28 = vrot.slane %v3808_v18, 1  ;;  %v1258_v59 = vrot.slane %v2831_v25, 1  ;;  %4645 = vst [vmem:[#allocation19_spill] sm:$0xff] %v3887_v42  ;;  %4646 = vst [vmem:[#allocation20_spill] sm:$0xff] %v3891_v10  ;;  %v1491_v9 = vrot.slane %v3780_v7, 2  ;;  %v3908_v10 = vld [vmem:[%s3519_s7 + $0xe0] sm:$0xff] }
  0x2e   : > { %4638 = vst [vmem:[#allocation12_spill] sm:$0xff] %v3838_v50  ;;  %3179 = vmatmul.mubr.msk.f32.gmra.mxu0 %vm370_vm2, %v742_v13  ;;  %3277 = vmatprep.subr.msk.mxu0 %vm403_vm0, %v3804_v4  ;;  %v3864_v13 = vsel %vm327_vm1, %v3673_v58, %v1253_v52  ;;  %v3883_v50 = vsel %vm732_vm3, %v3721_v31, %v1466_v43  ;;  %v2214_v43 = vrot.slane %v3808_v18, 2  ;;  %4649 = vst [vmem:[#allocation23_spill] sm:$0xff] %v3908_v10  ;;  %v2899_v42 = vld [vmem:[%s3519_s7 + $0x88] sm:$0x3] }
  0x2f   : > { %3153 = vmatmul.mubr.msk.f32.gmra.mxu1 %vm370_vm2, %v3552_v17  ;;  %3181 = vmatprep.mubr.msk.f32.mxu0 %vm370_vm2, %v3762_v3  ;;  %4641 = vst [vmem:[#allocation15_spill] sm:$0xff] %v3864_v13  ;;  %v3874_v3 = vsel %vm327_vm1, %v1255_v37, %v3856_v28  ;;  %v3878_v52 = vsel %vm327_vm1, %v3856_v28, %v1258_v59  ;;  %v1481_v13 = vrot.slane %v3744_v57, 2  ;;  %4644 = vst [vmem:[#allocation18_spill] sm:$0xff] %v3883_v50  ;;  %v2890_v59 = vld [vmem:[%s3519_s7 + $0x40] sm:$0x3] }
  0x30   : > { %3155 = vmatprep.mubr.msk.f32.mxu1 %vm370_vm2, %v3598_v33  ;;  %4642 = vst [vmem:[#allocation16_spill] sm:$0xff] %v3874_v3  ;;  %4643 = vst [vmem:[#allocation17_spill] sm:$0xff] %v3878_v52  ;;  %v1486_v37 = vrot.slane %v3757_v62, 2  ;;  %v3895_v3 = vld [vmem:[%s3519_s7 + $0xd8] sm:$0xff]  ;;  %v2896_v62 = vld [vmem:[%s3519_s7 + $0x70] sm:$0x3]  ;;  %v3926_v50 = vsel %vm732_vm3, %v3844_v60, %v1491_v9 }
  0x31   : > { %4647 = vst [vmem:[#allocation21_spill] sm:$0xff] %v3895_v3  ;;  %v2893_v52 = vld [vmem:[%s3519_s7 + $0x58] sm:$0x3]  ;;  %v3902_v57 = vsel %vm732_vm3, %v3738_v51, %v1481_v13  ;;  %v1980_v23 = vrot.slane %v3895_v3, 1  ;;  %v2218_v7 = vrot.slane %v3895_v3, 2  ;;  %v1496_v13 = vrot.slane %v2831_v25, 2 }
  0x32   : > { %3182 = vmatmul.mubr.msk.f32.gmra.mxu0 %vm370_vm2, %v747_v27  ;;  %4648 = vst [vmem:[#allocation22_spill] sm:$0xff] %v3902_v57  ;;  %v3917_v27 = vsel %vm732_vm3, %v3754_v61, %v1486_v37  ;;  %v1981_v57 = vrot.slane %v3908_v10, 1  ;;  %4651 = vst [vmem:[#allocation25_spill] sm:$0xff] %v3926_v50  ;;  %v2219_v37 = vrot.slane %v3908_v10, 2  ;;  %v2186_v25 = vrot.slane %v2890_v59, 2 }
  0x33   : > { %3156 = vmatmul.mubr.msk.f32.gmra.mxu1 %vm370_vm2, %v3601_v34  ;;  %3184 = vmatprep.mubr.msk.f32.mxu0 %vm370_vm2, %v3768_v0  ;;  %4650 = vst [vmem:[#allocation24_spill] sm:$0xff] %v3917_v27  ;;  %v3929_v0 = vsel %vm732_vm3, %v1493_v55, %v2214_v43  ;;  %v1948_v27 = vrot.slane %v2890_v59, 1  ;;  %v3933_v3 = vsel %vm732_vm3, %v2214_v43, %v1496_v13  ;;  %v1953_v18 = vrot.slane %v2893_v52, 1  ;;  %v2905_v50 = vld [vmem:[%s3519_s7 + $0xb8] sm:$0x3] }
  0x34   : > { %3158 = vmatprep.mubr.msk.f32.mxu1 %vm370_vm2, %v3641_v47  ;;  %4652 = vst [vmem:[#allocation26_spill] sm:$0xff] %v3929_v0  ;;  %v2191_v22 = vrot.slane %v2893_v52, 2  ;;  %v1958_v55 = vrot.slane %v2896_v62, 1  ;;  %v2196_v0 = vrot.slane %v2896_v62, 2  ;;  %v1963_v10 = vrot.slane %v2899_v42, 1 }
  0x35   : > { %v3940_v9 = vsel %vm327_vm1, %v3614_v38, %v1948_v27  ;;  %v3949_v52 = vsel %vm732_vm3, %v3721_v31, %v2186_v25  ;;  %v2201_v62 = vrot.slane %v2899_v42, 2  ;;  %v2908_v27 = vld [vmem:[%s3519_s7 + $0xd0] sm:$0x3]  ;;  %v1968_v25 = vrot.slane %v2902_v32, 1 }
  0x36   : > { %3185 = vmatmul.mubr.msk.f32.gmra.mxu0 %vm370_vm2, %v3772_v1  ;;  %v3953_v1 = vsel %vm327_vm1, %v3669_v56, %v1953_v18  ;;  %v3957_v59 = vsel %vm732_vm3, %v3727_v40, %v2191_v22  ;;  %v3964_v13 = vsel %vm327_vm1, %v3540_v11, %v1958_v55  ;;  %v3968_v31 = vsel %vm732_vm3, %v3733_v26, %v2196_v0  ;;  %v2911_v22 = vld [vmem:[%s3519_s7 + $0xe8] sm:$0x3] }
  0x37   : > { %3159 = vmatmul.mubr.msk.f32.gmra.mxu1 %vm370_vm2, %v3644_v48  ;;  %3187 = vmatprep.mubr.msk.f32.mxu0 %vm370_vm2, %v3791_v12  ;;  %4653 = vst [vmem:[#allocation27_spill] sm:$0xff] %v3953_v1  ;;  %4654 = vst [vmem:[#allocation28_spill] sm:$0xff] %v3957_v59  ;;  %v3972_v18 = vsel %vm327_vm1, %v3593_v30, %v1963_v10  ;;  %v3977_v42 = vsel %vm732_vm3, %v3738_v51, %v2201_v62  ;;  %v2206_v40 = vrot.slane %v2902_v32, 2 }
  0x38   : > { %3161 = vmatprep.mubr.msk.f32.mxu1 %vm370_vm2, %v3528_v5  ;;  %v1973_v1 = vrot.slane %v2905_v50, 1  ;;  %v2211_v59 = vrot.slane %v2905_v50, 2  ;;  %v3983_v26 = vsel %vm327_vm1, %v3635_v45, %v1968_v25  ;;  %v1978_v0 = vrot.slane %v2908_v27, 1  ;;  %v4663_v25 = vld [vmem:[#allocation5_spill] sm:$0xff] }
  0x39   : > { %v2216_v55 = vrot.slane %v2908_v27, 2  ;;  %v3986_v30 = vsel %vm327_vm1, %v1980_v23, %v1981_v57  ;;  %v3994_v51 = vsel %vm732_vm3, %v3754_v61, %v2206_v40  ;;  %v4014_v23 = vsel %vm732_vm3, %v2218_v7, %v2219_v37  ;;  %v4662_v27 = vld [vmem:[#allocation14_spill] sm:$0xff]  ;;  %v4665_v40 = vld [vmem:[#allocation16_spill] sm:$0xff] }
  0x3a   : > { %3188 = vmatmul.mubr.msk.f32.gmra.mxu0 %vm370_vm2, %v3795_v15  ;;  %v3998_v10 = vsel %vm327_vm1, %v3673_v58, %v1973_v1  ;;  %v4002_v45 = vsel %vm732_vm3, %v3844_v60, %v2211_v59  ;;  %v1983_v15 = vrot.slane %v2911_v22, 1  ;;  %v4008_v32 = vsel %vm327_vm1, %v3856_v28, %v1978_v0  ;;  %v4666_v0 = vld [vmem:[#allocation10_spill] sm:$0xff] }
  0x3b   : > { %3162 = vmatmul.mubr.msk.f32.gmra.mxu1 %vm370_vm2, %v3533_v8  ;;  %3190 = vmatprep.mubr.msk.f32.mxu0 %vm370_vm2, %v3799_v16  ;;  %v4011_v50 = vsel %vm732_vm3, %v2214_v43, %v2216_v55  ;;  %v2221_v58 = vrot.slane %v2911_v22, 2  ;;  %v4655_v28 = vrot.slane %v3638_v46, 2  ;;  %v1228_v62 = vrot.slane %v3831_v44, 1  ;;  %v4664_v22 = vld [vmem:[#allocation15_spill] sm:$0xff] }
  0x3c   : > { %3164 = vmatprep.mubr.msk.f32.mxu1 %vm370_vm2, %v3556_v19  ;;  %v4017_v1 = vsel %vm327_vm1, %v1981_v57, %v1983_v15  ;;  %v771_v57 = vrot.slane %v3685_v63, 2  ;;  %v4667_v15 = vld [vmem:[#allocation17_spill] sm:$0xff] }
  0x3d   : > { %v4022_v59 = vsel %vm732_vm3, %v2219_v37, %v2221_v58  ;;  %v767_v43 = vsel %vm732_vm3, %v3754_v61, %v4655_v28  ;;  %v2810_v37 = vld [vmem:[%s3519_s7 + $0x28] sm:$0x3]  ;;  %s4294_s7 = scalar_lea.vmem %s4603_s3, %s2748_s30 }
  0x3e   : > { %3191 = vmatmul.mubr.msk.f32.gmra.mxu0 %vm370_vm2, %v3817_v29  ;;  %v4656_v29 = vrot.slane %v3656_v53, 2  ;;  %v772_v46 = vsel %vm732_vm3, %v3844_v60, %v771_v57  ;;  %v1223_v63 = vrot.slane %v2810_v37, 1  ;;  %v1461_v55 = vrot.slane %v2810_v37, 2  ;;  %v4668_v58 = vld [vmem:[#allocation11_spill] sm:$0xff] }
  0x3f   : > { %3165 = vmatmul.mubr.msk.f32.gmra.mxu1 %vm370_vm2, %v3559_v20  ;;  %3193 = vmatprep.mubr.msk.f32.mxu0 %vm370_vm2, %v3826_v21  ;;  %v4669_v28 = vld [vmem:[#allocation7_spill] sm:$0xff] }
  0x40   : > { %3167 = vmatprep.mubr.msk.f32.mxu1 %vm370_vm2, %v3604_v35  ;;  %v4039_v7 = vsel %vm732_vm3, %v4656_v29, %v3844_v60  ;;  %v1224_v61 = vsel %vm327_vm1, %v3573_v24, %v1223_v63  ;;  %v2930_v60 = vld [vmem:[%s4601_s1 + $0x1c] sm:$0xf]  ;;  %v1229_v24 = vsel %vm327_vm1, %v3614_v38, %v1228_v62  ;;  %v4671_v29 = vld [vmem:[#allocation8_spill] sm:$0xff]  ;;  %v4674_v37 = vld [vmem:[#allocation19_spill] sm:$0xff] }
  0x41   : > { %v4657_v38 = vld [vmem:[#allocation13_spill] sm:$0xff] }
  0x42   : > { %3194 = vmatmul.mubr.msk.f32.gmra.mxu0 %vm370_vm2, %v767_v43  ;;  %v4670_v43 = vld [vmem:[#allocation6_spill] sm:$0xff] }
  0x43   : > { %3168 = vmatmul.mubr.msk.f32.gmra.mxu1 %vm370_vm2, %v3617_v39  ;;  %3196 = vmatprep.mubr.msk.f32.mxu0 %vm370_vm2, %v4039_v7  ;;  %v1462_v57 = vsel %vm732_vm3, %v4670_v43, %v1461_v55 }
  0x44   : > { %3170 = vmatprep.mubr.msk.f32.mxu1 %vm370_vm2, %v3656_v53 }
  0x46   : > { %3197 = vmatmul.mubr.msk.f32.gmra.mxu0 %vm370_vm2, %v772_v46 }
  0x47   : > { %3171 = vmatmul.mubr.msk.f32.gmra.mxu1 %vm370_vm2, %v3659_v54  ;;  %3227 = vmatprep.mubr.msk.f32.mxu0 %vm370_vm2, %v3610_v36  ;;  %v1233_v36 = vrot.slane %v3834_v41, 1  ;;  %v4660_v41 = vld [vmem:[#allocation12_spill] sm:$0xff] }
  0x48   : > { %3201 = vmatprep.mubr.msk.f32.mxu1 %vm370_vm2, %v3547_v14  ;;  %v2948_v14 = vld [vmem:[%s4601_s1 + $0x20] sm:$0xf] }
  0x4a   : > { %3228 = vmatmul.mubr.msk.f32.vlgmr.msra.gmra.mxu0 %vm370_vm2, %v1224_v61 }
  0x4b   : > { %3202 = vmatmul.mubr.msk.f32.vlgmr.msra.gmra.mxu1 %vm370_vm2, %v3552_v17  ;;  %3278 = vmatpush3.msk.msra.mxu0 %vm403_vm0, %v3804_v4  ;;  %v1234_v17 = vsel %vm327_vm1, %v3669_v56, %v1233_v36  ;;  %v4658_v4 = vld [vmem:[#allocation2_spill] sm:$0xff]  ;;  %v4659_v56 = vld [vmem:[#allocation3_spill] sm:$0xff] }
  0x4c   : > { %3252 = vmatpush3.msk.msra.mxu1 %vm403_vm0, %v3777_v6  ;;  %3204 = vmatprep.mubr.msk.f32.mxu1 %vm370_vm2, %v3598_v33  ;;  %v1238_v6 = vrot.slane %v4657_v38, 1 }
  0x4d   : > { %3230 = vmatprep.mubr.msk.f32.mxu0 %vm370_vm2, %v3650_v49  ;;  %3303 = vmatprep.subr.msk.mxu1 %vm403_vm0, %v2930_v60 }
  0x4e   : > { %3231 = vmatmul.mubr.msk.f32.gmra.mxu0 %vm370_vm2, %v1229_v24  ;;  %3329 = vmatprep.subr.msk.mxu0 %vm403_vm0, %v2948_v14  ;;  %v1239_v44 = vsel %vm327_vm1, %v3540_v11, %v1238_v6  ;;  %v4661_v11 = vld [vmem:[#allocation4_spill] sm:$0xff] }
  0x4f   : > { %3205 = vmatmul.mubr.msk.f32.gmra.mxu1 %vm370_vm2, %v3601_v34  ;;  %3233 = vmatprep.mubr.msk.f32.mxu0 %vm370_vm2, %v3694_v2 }
  0x50   : > { %3207 = vmatprep.mubr.msk.f32.mxu1 %vm370_vm2, %v3641_v47 }
  0x52   : > { %3234 = vmatmul.mubr.msk.f32.gmra.mxu0 %vm370_vm2, %v1234_v17 }
  0x53   : > { %3208 = vmatmul.mubr.msk.f32.gmra.mxu1 %vm370_vm2, %v3644_v48  ;;  %3236 = vmatprep.mubr.msk.f32.mxu0 %vm370_vm2, %v4658_v4 }
  0x54   : > { %3210 = vmatprep.mubr.msk.f32.mxu1 %vm370_vm2, %v3528_v5 }
  0x56   : > { %3237 = vmatmul.mubr.msk.f32.gmra.mxu0 %vm370_vm2, %v1239_v44 }
  0x57   : > { %3211 = vmatmul.mubr.msk.f32.gmra.mxu1 %vm370_vm2, %v3533_v8  ;;  %3239 = vmatprep.mubr.msk.f32.mxu0 %vm370_vm2, %v4659_v56 }
  0x58   : > { %3213 = vmatprep.mubr.msk.f32.mxu1 %vm370_vm2, %v3556_v19 }
  0x5a   : > { %3240 = vmatmul.mubr.msk.f32.gmra.mxu0 %vm370_vm2, %v4660_v41 }
  0x5b   : > { %3214 = vmatmul.mubr.msk.f32.gmra.mxu1 %vm370_vm2, %v3559_v20  ;;  %3242 = vmatprep.mubr.msk.f32.mxu0 %vm370_vm2, %v4661_v11 }
  0x5c   : > { %3216 = vmatprep.mubr.msk.f32.mxu1 %vm370_vm2, %v3604_v35 }
  0x5e   : > { %3243 = vmatmul.mubr.msk.f32.gmra.mxu0 %vm370_vm2, %v4662_v27  ;;  %v3439_v27 = vmov 0.0  }
  0x5f   : > { %3217 = vmatmul.mubr.msk.f32.gmra.mxu1 %vm370_vm2, %v3617_v39  ;;  %3245 = vmatprep.mubr.msk.f32.mxu0 %vm370_vm2, %v4663_v25  ;;  %2442 = vst.msk [vmem:[%s4294_s7] sm:$0xff] %vm2421_vm4, %v3439_v27  ;;  %2443 = vst.msk [vmem:[%s4299_s10] sm:$0xff] %vm2421_vm4, %v3439_v27 }
  0x60   : > { %3219 = vmatprep.mubr.msk.f32.mxu1 %vm370_vm2, %v3656_v53 }
  0x62   : > { %3246 = vmatmul.mubr.msk.f32.gmra.mxu0 %vm370_vm2, %v4664_v22 }
  0x63   : > { %3220 = vmatmul.mubr.msk.f32.gmra.mxu1 %vm370_vm2, %v3659_v54  ;;  %3248 = vmatprep.mubr.msk.f32.mxu0 %vm370_vm2, %v4665_v40 }
  0x64   : > { %3222 = vmatprep.mubr.msk.f32.mxu1 %vm370_vm2, %v4666_v0 }
  0x66   : > { %3249 = vmatmul.mubr.msk.f32.gmra.mxu0 %vm370_vm2, %v4667_v15 }
  0x67   : > { %3223 = vmatmul.mubr.msk.f32.gmra.mxu1 %vm370_vm2, %v4668_v58  ;;  %3279 = vmatprep.mubr.msk.f32.mxu0 %vm370_vm2, %v3598_v33  ;;  %v4672_v33 = vld [vmem:[#allocation18_spill] sm:$0xff] }
  0x68   : > { %3253 = vmatprep.mubr.msk.f32.mxu1 %vm370_vm2, %v4669_v28 }
  0x6a   : > { %3280 = vmatmul.mubr.msk.f32.vlgmr.msra.gmra.mxu0 %vm370_vm2, %v3601_v34  ;;  %v4673_v34 = vld [vmem:[#allocation9_spill] sm:$0xff] }
  0x6b   : > { %3254 = vmatmul.mubr.msk.f32.vlgmr.msra.gmra.mxu1 %vm370_vm2, %v1462_v57  ;;  %3330 = vmatpush3.msk.msra.mxu0 %vm403_vm0, %v2948_v14 }
  0x6c   : > { %3304 = vmatpush3.msk.msra.mxu1 %vm403_vm0, %v2930_v60  ;;  %3256 = vmatprep.mubr.msk.f32.mxu1 %vm370_vm2, %v4671_v29 }
  0x6d   : > { %3282 = vmatprep.mubr.msk.f32.mxu0 %vm370_vm2, %v3641_v47  ;;  %v4675_v47 = vld [vmem:[#allocation20_spill] sm:$0xff] }
  0x6e   : > { %3283 = vmatmul.mubr.msk.f32.gmra.mxu0 %vm370_vm2, %v3644_v48  ;;  %v4682_v48 = vld [vmem:[#allocation28_spill] sm:$0xff] }
  0x6f   : > { %3257 = vmatmul.mubr.msk.f32.gmra.mxu1 %vm370_vm2, %v4672_v33  ;;  %3285 = vmatprep.mubr.msk.f32.mxu0 %vm370_vm2, %v3528_v5  ;;  %v4676_v5 = vld [vmem:[#allocation22_spill] sm:$0xff] }
  0x70   : > { %3259 = vmatprep.mubr.msk.f32.mxu1 %vm370_vm2, %v4673_v34 }
  0x72   : > { %3286 = vmatmul.mubr.msk.f32.gmra.mxu0 %vm370_vm2, %v3533_v8  ;;  %v4677_v8 = vld [vmem:[#allocation24_spill] sm:$0xff] }
  0x73   : > { %3260 = vmatmul.mubr.msk.f32.gmra.mxu1 %vm370_vm2, %v4674_v37  ;;  %3288 = vmatprep.mubr.msk.f32.mxu0 %vm370_vm2, %v3556_v19  ;;  %v4678_v19 = vld [vmem:[#allocation25_spill] sm:$0xff] }
  0x74   : > { %3262 = vmatprep.mubr.msk.f32.mxu1 %vm370_vm2, %v3791_v12 }
  0x76   : > { %3289 = vmatmul.mubr.msk.f32.gmra.mxu0 %vm370_vm2, %v3559_v20  ;;  %v4679_v20 = vld [vmem:[#allocation21_spill] sm:$0xff] }
  0x77   : > { %3263 = vmatmul.mubr.msk.f32.gmra.mxu1 %vm370_vm2, %v4675_v47  ;;  %3291 = vmatprep.mubr.msk.f32.mxu0 %vm370_vm2, %v3604_v35  ;;  %v4680_v35 = vld [vmem:[#allocation26_spill] sm:$0xff] }
  0x78   : > { %3265 = vmatprep.mubr.msk.f32.mxu1 %vm370_vm2, %v3799_v16 }
  0x7a   : > { %3292 = vmatmul.mubr.msk.f32.gmra.mxu0 %vm370_vm2, %v3617_v39  ;;  %v4681_v39 = vld [vmem:[#allocation23_spill] sm:$0xff] }
  0x7b   : > { %3266 = vmatmul.mubr.msk.f32.gmra.mxu1 %vm370_vm2, %v4676_v5  ;;  %3294 = vmatprep.mubr.msk.f32.mxu0 %vm370_vm2, %v3656_v53  ;;  %v4683_v53 = vld [vmem:[#allocation27_spill] sm:$0xff] }
  0x7c   : > { %3268 = vmatprep.mubr.msk.f32.mxu1 %vm370_vm2, %v3826_v21 }
  0x7e   : > { %3295 = vmatmul.mubr.msk.f32.gmra.mxu0 %vm370_vm2, %v3659_v54 }
  0x7f   : > { %3269 = vmatmul.mubr.msk.f32.gmra.mxu1 %vm370_vm2, %v4677_v8  ;;  %3297 = vmatprep.mubr.msk.f32.mxu0 %vm370_vm2, %v4666_v0 }
  0x80   : > { %3271 = vmatprep.mubr.msk.f32.mxu1 %vm370_vm2, %v4039_v7 }
  0x82   : > { %3298 = vmatmul.mubr.msk.f32.gmra.mxu0 %vm370_vm2, %v4668_v58 }
  0x83   : > { %3272 = vmatmul.mubr.msk.f32.gmra.mxu1 %vm370_vm2, %v4678_v19  ;;  %3300 = vmatprep.mubr.msk.f32.mxu0 %vm370_vm2, %v4679_v20 }
  0x84   : > { %3274 = vmatprep.mubr.msk.f32.mxu1 %vm370_vm2, %v4680_v35 }
  0x86   : > { %3301 = vmatmul.mubr.msk.f32.gmra.mxu0 %vm370_vm2, %v4681_v39 }
  0x87   : > { %3275 = vmatmul.mubr.msk.f32.gmra.mxu1 %vm370_vm2, %v3933_v3  ;;  %3331 = vmatprep.mubr.msk.f32.mxu0 %vm370_vm2, %v4671_v29 }
  0x88   : > { %3305 = vmatprep.mubr.msk.f32.mxu1 %vm370_vm2, %v3650_v49 }
  0x8a   : > { %3332 = vmatmul.mubr.msk.f32.vlgmr.msra.gmra.mxu0 %vm370_vm2, %v3949_v52 }
  0x8b   : > { %3306 = vmatmul.mubr.msk.f32.vlgmr.msra.gmra.mxu1 %vm370_vm2, %v3940_v9  ;;  %3334 = vmatprep.mubr.msk.f32.mxu0 %vm370_vm2, %v4673_v34 }
  0x8c   : > { %3308 = vmatprep.mubr.msk.f32.mxu1 %vm370_vm2, %v3694_v2 }
  0x8e   : > { %3335 = vmatmul.mubr.msk.f32.gmra.mxu0 %vm370_vm2, %v4682_v48 }
  0x8f   : > { %3309 = vmatmul.mubr.msk.f32.gmra.mxu1 %vm370_vm2, %v4683_v53  ;;  %3337 = vmatprep.mubr.msk.f32.mxu0 %vm370_vm2, %v3791_v12 }
  0x90   : > { %3311 = vmatprep.mubr.msk.f32.mxu1 %vm370_vm2, %v4658_v4 }
  0x92   : > { %3338 = vmatmul.mubr.msk.f32.gmra.mxu0 %vm370_vm2, %v3968_v31 }
  0x93   : > { %3312 = vmatmul.mubr.msk.f32.gmra.mxu1 %vm370_vm2, %v3964_v13  ;;  %3340 = vmatprep.mubr.msk.f32.mxu0 %vm370_vm2, %v3799_v16 }
  0x94   : > { %3314 = vmatprep.mubr.msk.f32.mxu1 %vm370_vm2, %v4659_v56 }
  0x96   : > { %3341 = vmatmul.mubr.msk.f32.gmra.mxu0 %vm370_vm2, %v3977_v42 }
  0x97   : > { %3315 = vmatmul.mubr.msk.f32.gmra.mxu1 %vm370_vm2, %v3972_v18  ;;  %3343 = vmatprep.mubr.msk.f32.mxu0 %vm370_vm2, %v3826_v21 }
  0x98   : > { %3317 = vmatprep.mubr.msk.f32.mxu1 %vm370_vm2, %v4661_v11 }
  0x9a   : > { %3344 = vmatmul.mubr.msk.f32.gmra.mxu0 %vm370_vm2, %v3994_v51 }
  0x9b   : > { %3318 = vmatmul.mubr.msk.f32.gmra.mxu1 %vm370_vm2, %v3983_v26  ;;  %3346 = vmatprep.mubr.msk.f32.mxu0 %vm370_vm2, %v4039_v7 }
  0x9c   : > { %3320 = vmatprep.mubr.msk.f32.mxu1 %vm370_vm2, %v4663_v25 }
  0x9e   : > { %3347 = vmatmul.mubr.msk.f32.gmra.mxu0 %vm370_vm2, %v4002_v45 }
  0x9f   : > { %3321 = vmatmul.mubr.msk.f32.gmra.mxu1 %vm370_vm2, %v3998_v10  ;;  %3349 = vmatprep.mubr.msk.f32.mxu0 %vm370_vm2, %v4680_v35 }
  0xa0   : > { %3323 = vmatprep.mubr.msk.f32.mxu1 %vm370_vm2, %v4665_v40 }
  0xa2   : > { %3350 = vmatmul.mubr.msk.f32.gmra.mxu0 %vm370_vm2, %v4011_v50 }
  0xa3   : > { %3324 = vmatmul.mubr.msk.f32.gmra.mxu1 %vm370_vm2, %v4008_v32  ;;  %3352 = vmatprep.mubr.msk.f32.mxu0 %vm370_vm2, %v4014_v23 }
  0xa4   : > { %3326 = vmatprep.mubr.msk.f32.mxu1 %vm370_vm2, %v3986_v30 }
  0xa6   : > { %3353 = vmatmul.mubr.msk.f32.gmra.mxu0 %vm370_vm2, %v4022_v59 }
  0xa7   : > { %3327 = vmatmul.mubr.msk.f32.gmra.mxu1 %vm370_vm2, %v4017_v1 }
  0xda   : > { %v3125_v49 = vpop.f32.mrf.mxu0 }
  0xdb   : > { %v3137_v54 = vpop.f32.mrf.mxu1 }
  0xdc   : > { %v473_v2 = vpop.f32.mrf.mxu0 }
  0xdd   : > { %v513_v3 = vpop.f32.mrf.mxu1 }
  0xde   : > { %v3128_v12 = vpop.f32.mrf.mxu0 }
  0xdf   : > { %v4268_v16 = vpop.f32.mrf.mxu1 }
  0xe0   : > { %v483_v21 = vpop.f32.mrf.mxu0 }
  0xe1   : > { %v4270_v9 = vpop.f32.mrf.mxu1 }
  0xe2   : > { %v3131_v52 = vpop.f32.mrf.mxu0 }
  0xe3   : > { %v4272_v13 = vpop.f32.mrf.mxu1 }
  0xe4   : > { %v493_v31 = vpop.f32.mrf.mxu0 }
  0xe5   : > { %v4274_v18 = vpop.f32.mrf.mxu1 }
  0xe6   : > { %v3134_v42 = vpop.f32.mrf.mxu0 }
  0xe7   : > { %v4276_v26 = vpop.f32.mrf.mxu1 }
  0xe8   : > { %v503_v30 = vpop.f32.mrf.mxu0 }
  0xe9   : > { %v4278_v51 = vpop.f32.mrf.mxu1 }
  0xea   : > { %v3177_v10 = vpop.f32.mrf.mxu0 }
  0xeb   : > { %v3151_v45 = vpop.f32.mrf.mxu1 }
  0xec   : > { %v659_v32 = vadd.f32 %v3151_v45, %v3125_v49  ;;  %v876_v50 = vpop.f32.mrf.mxu0 }
  0xed   : > { %v653_v23 = vpop.f32.mrf.mxu1 }
  0xee   : > { %v4280_v1 = vadd.f32 %v3177_v10, %v659_v32  ;;  %v654_v59 = vadd.f32 %v653_v23, %v473_v2  ;;  %v3180_v7 = vpop.f32.mrf.mxu0 }
  0xef   : > { %v3154_v46 = vpop.f32.mrf.mxu1 }
  0xf0   : > { %v4283_v63 = vadd.f32 %v876_v50, %v654_v59  ;;  %v669_v61 = vadd.f32 %v3154_v46, %v3128_v12  ;;  %v886_v62 = vpop.f32.mrf.mxu0 }
  0xf1   : > { %v663_v60 = vpop.f32.mrf.mxu1 }
  0xf2   : > { %v4286_v24 = vadd.f32 %v3180_v7, %v669_v61  ;;  %v664_v36 = vadd.f32 %v663_v60, %v483_v21  ;;  %v3183_v14 = vpop.f32.mrf.mxu0 }
  0xf3   : > { %v3157_v17 = vpop.f32.mrf.mxu1 }
  0xf4   : > { %v4289_v38 = vadd.f32 %v886_v62, %v664_v36  ;;  %v679_v6 = vadd.f32 %v3157_v17, %v3131_v52  ;;  %v896_v4 = vpop.f32.mrf.mxu0 }
  0xf5   : > { %v673_v44 = vpop.f32.mrf.mxu1 }
  0xf6   : > { %v4301_v56 = vadd.f32 %v3183_v14, %v679_v6  ;;  %v674_v41 = vadd.f32 %v673_v44, %v493_v31  ;;  %v3186_v11 = vpop.f32.mrf.mxu0 }
  0xf7   : > { %v3160_v25 = vpop.f32.mrf.mxu1 }
  0xf8   : > { %v4307_v22 = vadd.f32 %v896_v4, %v674_v41  ;;  %v689_v40 = vadd.f32 %v3160_v25, %v3134_v42  ;;  %v906_v0 = vpop.f32.mrf.mxu0 }
  0xf9   : > { %v683_v55 = vpop.f32.mrf.mxu1 }
  0xfa   : > { %v4309_v15 = vadd.f32 %v3186_v11, %v689_v40  ;;  %v684_v58 = vadd.f32 %v683_v55, %v503_v30  ;;  %v3189_v28 = vpop.f32.mrf.mxu0 }
  0xfb   : > { %v3163_v43 = vpop.f32.mrf.mxu1 }
  0xfc   : > { %v4311_v57 = vadd.f32 %v906_v0, %v684_v58  ;;  %v699_v29 = vadd.f32 %v3163_v43, %v3137_v54  ;;  %v916_v33 = vpop.f32.mrf.mxu0 }
  0xfd   : > { %v693_v34 = vpop.f32.mrf.mxu1 }
  0xfe   : > { %v4313_v37 = vadd.f32 %v3189_v28, %v699_v29  ;;  %v694_v47 = vadd.f32 %v693_v34, %v513_v3  ;;  %v3192_v5 = vpop.f32.mrf.mxu0 }
  0xff   : > { %v3166_v8 = vpop.f32.mrf.mxu1 }
 0x100   : > { %v4315_v19 = vadd.f32 %v916_v33, %v694_v47  ;;  %v709_v20 = vadd.f32 %v3166_v8, %v4268_v16  ;;  %v926_v35 = vpop.f32.mrf.mxu0 }
 0x101   : > { %v703_v39 = vpop.f32.mrf.mxu1 }
 0x102   : > { %v4318_v48 = vadd.f32 %v3192_v5, %v709_v20  ;;  %v704_v53 = vadd.f32 %v703_v39, %v4270_v9  ;;  %v3195_v49 = vpop.f32.mrf.mxu0 }
 0x103   : > { %v3169_v2 = vpop.f32.mrf.mxu1 }
 0x104   : > { %v4321_v54 = vadd.f32 %v926_v35, %v704_v53  ;;  %v719_v12 = vadd.f32 %v3169_v2, %v4272_v13  ;;  %v936_v21 = vpop.f32.mrf.mxu0 }
 0x105   : > { %v713_v3 = vpop.f32.mrf.mxu1 }
 0x106   : > { %v4324_v52 = vadd.f32 %v3195_v49, %v719_v12  ;;  %v714_v31 = vadd.f32 %v713_v3, %v4274_v18  ;;  %v3198_v42 = vpop.f32.mrf.mxu0 }
 0x107   : > { %v3172_v16 = vpop.f32.mrf.mxu1 }
 0x108   : > { %v4327_v30 = vadd.f32 %v936_v21, %v714_v31  ;;  %v729_v10 = vadd.f32 %v3172_v16, %v4276_v26  ;;  %v946_v45 = vpop.f32.mrf.mxu0 }
 0x109   : > { %v723_v9 = vpop.f32.mrf.mxu1 }
 0x10a   : > { %v4330_v32 = vadd.f32 %v3198_v42, %v729_v10  ;;  %v724_v50 = vadd.f32 %v723_v9, %v4278_v51  ;;  %v4333_v23 = vpop.f32.mrf.mxu0 }
 0x10b   : > { %v3203_v13 = vpop.f32.mrf.mxu1 }
 0x10c   : > { %v4335_v59 = vadd.f32 %v946_v45, %v724_v50  ;;  %v4337_v7 = vpop.f32.mrf.mxu0 }
 0x10d   : > { %v1117_v18 = vpop.f32.mrf.mxu1 }
 0x10e   : > { %v4339_v46 = vpop.f32.mrf.mxu0 }
 0x10f   : > { %v3206_v61 = vpop.f32.mrf.mxu1 }
 0x110   : > { %v4341_v62 = vpop.f32.mrf.mxu0 }
 0x111   : > { %v1127_v26 = vpop.f32.mrf.mxu1 }
 0x112   : > { %v4343_v60 = vpop.f32.mrf.mxu0 }
 0x113   : > { %v3209_v36 = vpop.f32.mrf.mxu1 }
 0x114   : > { %v4345_v14 = vpop.f32.mrf.mxu0 }
 0x115   : > { %v1137_v51 = vpop.f32.mrf.mxu1 }
 0x116   : > { %v4347_v17 = vpop.f32.mrf.mxu0 }
 0x117   : > { %v3212_v6 = vpop.f32.mrf.mxu1 }
 0x118   : > { %v4349_v4 = vpop.f32.mrf.mxu0 }
 0x119   : > { %v1147_v44 = vpop.f32.mrf.mxu1 }
 0x11a   : > { %v4351_v41 = vpop.f32.mrf.mxu0 }
 0x11b   : > { %v4353_v11 = vpop.f32.mrf.mxu1 }
 0x11c   : > { %v4355_v27 = vpop.f32.mrf.mxu0 }
 0x11d   : > { %v4357_v25 = vpop.f32.mrf.mxu1 }
 0x11e   : > { %v4359_v40 = vpop.f32.mrf.mxu0 }
 0x11f   : > { %v4361_v0 = vpop.f32.mrf.mxu1 }
 0x120   : > { %v4363_v55 = vpop.f32.mrf.mxu0 }
 0x121   : > { %v4365_v58 = vpop.f32.mrf.mxu1 }
 0x122   : > { %v4367_v28 = vpop.f32.mrf.mxu0 }
 0x123   : > { %v4369_v43 = vpop.f32.mrf.mxu1 }
 0x124   : > { %v4371_v29 = vpop.f32.mrf.mxu0 }
 0x125   : > { %4684 = vst [vmem:[#allocation13_spill] sm:$0xff] %v4371_v29  ;;  %v4373_v33 = vpop.f32.mrf.mxu1 }
 0x126   : > { %v4375_v34 = vpop.f32.mrf.mxu0 }
 0x127   : > { %4685 = vst [vmem:[#allocation2_spill] sm:$0xff] %v4375_v34  ;;  %v4377_v47 = vpop.f32.mrf.mxu1 }
 0x128   : > { %v4379_v5 = vpop.f32.mrf.mxu0 }
 0x129   : > { %4686 = vst [vmem:[#allocation3_spill] sm:$0xff] %v4379_v5  ;;  %v4381_v8 = vpop.f32.mrf.mxu1 }
 0x12a   : > { %v3281_v20 = vpop.f32.mrf.mxu0 }
 0x12b   : > { %v3255_v35 = vpop.f32.mrf.mxu1 }
 0x12c   : > { %v4383_v39 = vpop.f32.mrf.mxu0 }
 0x12d   : > { %v1601_v53 = vpop.f32.mrf.mxu1 }
 0x12e   : > { %v4385_v49 = vpop.f32.mrf.mxu0 }
 0x12f   : > { %v3258_v2 = vpop.f32.mrf.mxu1 }
 0x130   : > { %v4387_v12 = vpop.f32.mrf.mxu0 }
 0x131   : > { %4687 = vst [vmem:[#allocation12_spill] sm:$0xff] %v4387_v12  ;;  %v1611_v21 = vpop.f32.mrf.mxu1 }
 0x132   : > { %v4389_v3 = vpop.f32.mrf.mxu0 }
 0x133   : > { %4688 = vst [vmem:[#allocation4_spill] sm:$0xff] %v4389_v3  ;;  %v3261_v31 = vpop.f32.mrf.mxu1 }
 0x134   : > { %v4391_v42 = vpop.f32.mrf.mxu0 }
 0x135   : > { %4689 = vst [vmem:[#allocation14_spill] sm:$0xff] %v4391_v42  ;;  %v4393_v16 = vpop.f32.mrf.mxu1 }
 0x136   : > { %v4395_v10 = vpop.f32.mrf.mxu0 }
 0x137   : > { %4690 = vst [vmem:[#allocation5_spill] sm:$0xff] %v4395_v10  ;;  %v4397_v45 = vpop.f32.mrf.mxu1  ;;  %v1197_v10 = vadd.f32 %v3203_v13, %v4280_v1  ;;  %v1200_v1 = vadd.f32 %v1137_v51, %v4307_v22 }
 0x138   : > { %4691 = vst [vmem:[#allocation15_spill] sm:$0xff] %v4397_v45  ;;  %v4399_v9 = vpop.f32.mrf.mxu0 }
 0x139   : > { %4692 = vst [vmem:[#allocation16_spill] sm:$0xff] %v4399_v9  ;;  %v4401_v50 = vpop.f32.mrf.mxu1 }
 0x13a   : > { %4693 = vst [vmem:[#allocation10_spill] sm:$0xff] %v4401_v50  ;;  %v4403_v5 = vpop.f32.mrf.mxu0 }
 0x13b   : > { %4694 = vst [vmem:[#allocation17_spill] sm:$0xff] %v4403_v5  ;;  %v4405_v34 = vpop.f32.mrf.mxu1  ;;  %v1196_v5 = vadd.f32 %v1117_v18, %v4283_v63  ;;  %v1203_v63 = vadd.f32 %v3212_v6, %v4309_v15  ;;  %v1446_v15 = vadd.f32 %v4345_v14, %v1200_v1 }
 0x13c   : > { %4695 = vst [vmem:[#allocation11_spill] sm:$0xff] %v4405_v34  ;;  %v4407_v12 = vpop.f32.mrf.mxu0 }
 0x13d   : > { %4696 = vst [vmem:[#allocation7_spill] sm:$0xff] %v4407_v12  ;;  %v4410_v3 = vpop.f32.mrf.mxu1  ;;  %v1199_v12 = vadd.f32 %v3206_v61, %v4286_v24  ;;  %v1442_v24 = vadd.f32 %v4337_v7, %v1196_v5  ;;  %v1205_v7 = vadd.f32 %v4353_v11, %v4313_v37  ;;  %v1449_v6 = vadd.f32 %v4347_v17, %v1203_v63  ;;  %v4705_v63 = vld [vmem:[#allocation14_spill] sm:$0xff] }
 0x13e   : > { %4697 = vst [vmem:[#allocation6_spill] sm:$0xff] %v4410_v3  ;;  %v4412_v42 = vpop.f32.mrf.mxu0  ;;  %v1198_v3 = vadd.f32 %v1127_v26, %v4289_v38  ;;  %v1202_v38 = vadd.f32 %v1147_v44, %v4311_v57  ;;  %v1206_v44 = vadd.f32 %v4365_v58, %v4321_v54  ;;  %v1209_v37 = vadd.f32 %v4369_v43, %v4324_v52 }
 0x13f   : > { %4698 = vst [vmem:[#allocation8_spill] sm:$0xff] %v4412_v42  ;;  %v4414_v29 = vpop.f32.mrf.mxu1  ;;  %v1443_v42 = vadd.f32 %v4333_v23, %v1197_v10  ;;  %v1445_v23 = vadd.f32 %v4339_v46, %v1199_v12  ;;  %v1680_v57 = vadd.f32 %v1601_v53, %v1442_v24  ;;  %v1204_v46 = vadd.f32 %v4357_v25, %v4315_v19  ;;  %v4701_v53 = vld [vmem:[#allocation2_spill] sm:$0xff] }
 0x140   : > { %4699 = vst [vmem:[#allocation18_spill] sm:$0xff] %v4414_v29  ;;  %v4417_v9 = vpop.f32.mrf.mxu0  ;;  %v1201_v29 = vadd.f32 %v3209_v36, %v4301_v56  ;;  %v1444_v56 = vadd.f32 %v4341_v62, %v1198_v3  ;;  %v1207_v62 = vadd.f32 %v4361_v0, %v4318_v48  ;;  %v1448_v14 = vadd.f32 %v4349_v4, %v1202_v38  ;;  %v4706_v38 = vld [vmem:[#allocation15_spill] sm:$0xff] }
 0x141   : > { %v4419_v50 = vpop.f32.mrf.mxu1  ;;  %v1681_v61 = vadd.f32 %v3255_v35, %v1443_v42  ;;  %v1208_v19 = vadd.f32 %v4373_v33, %v4327_v30  ;;  %v1211_v48 = vadd.f32 %v4377_v47, %v4330_v32  ;;  %v1210_v54 = vadd.f32 %v4381_v8, %v4335_v59  ;;  %v4704_v42 = vld [vmem:[#allocation4_spill] sm:$0xff] }
 0x142   : > { %v4422_v34 = vpop.f32.mrf.mxu0  ;;  %v1447_v22 = vadd.f32 %v4343_v60, %v1201_v29  ;;  %v1683_v29 = vadd.f32 %v3258_v2, %v1445_v23  ;;  %v1682_v25 = vadd.f32 %v1611_v21, %v1444_v56  ;;  %v1451_v4 = vadd.f32 %v4351_v41, %v1205_v7  ;;  %v4702_v2 = vld [vmem:[#allocation3_spill] sm:$0xff]  ;;  %v4703_v21 = vld [vmem:[#allocation12_spill] sm:$0xff]  ;;  %v4707_v23 = vld [vmem:[#allocation10_spill] sm:$0xff] }
 0x143   : > { %v4426_v45 = vpop.f32.mrf.mxu1  ;;  %v1922_v11 = vadd.f32 %v3281_v20, %v1681_v61  ;;  %v1921_v58 = vadd.f32 %v4383_v39, %v1680_v57  ;;  %v1450_v20 = vadd.f32 %v4355_v27, %v1204_v46  ;;  %v1453_v35 = vadd.f32 %v4359_v40, %v1207_v62  ;;  %v4700_v39 = vld [vmem:[#allocation13_spill] sm:$0xff] }
 0x144   : > { %v4431_v13 = vpop.f32.mrf.mxu0  ;;  %v1685_v52 = vadd.f32 %v3261_v31, %v1447_v22  ;;  %v1452_v30 = vadd.f32 %v4363_v55, %v1206_v44  ;;  %v1684_v32 = vadd.f32 %v4393_v16, %v1446_v15  ;;  %v1455_v41 = vadd.f32 %v4367_v28, %v1209_v37  ;;  %v4708_v22 = vld [vmem:[#allocation11_spill] sm:$0xff] }
 0x145   : > { %v4435_v18 = vpop.f32.mrf.mxu1  ;;  %v1924_v33 = vadd.f32 %v4385_v49, %v1683_v29  ;;  %v1454_v40 = vadd.f32 %v4700_v39, %v1208_v19  ;;  %v4487_v55 = vadd.f32 %v4701_v53, %v1211_v48  ;;  %v4490_v12 = vadd.f32 %v4702_v2, %v1210_v54  ;;  %v4714_v39 = vld [vmem:[#allocation7_spill] sm:$0xff] }
 0x146   : > { %v4439_v26 = vpop.f32.mrf.mxu0  ;;  %v1923_v3 = vadd.f32 %v4703_v21, %v1682_v25  ;;  %v1926_v16 = vadd.f32 %v4704_v42, %v1685_v52  ;;  %v1925_v24 = vadd.f32 %v4705_v63, %v1684_v32  ;;  %v1687_v61 = vadd.f32 %v4706_v38, %v1449_v6  ;;  %v4711_v52 = vld [vmem:[#allocation5_spill] sm:$0xff]  ;;  %v4715_v2 = vld [vmem:[#allocation8_spill] sm:$0xff] }
 0x147   : > { %v4443_v36 = vpop.f32.mrf.mxu1  ;;  %v1686_v56 = vadd.f32 %v4707_v23, %v1448_v14  ;;  %v1689_v15 = vadd.f32 %v4708_v22, %v1451_v4  ;;  %v1690_v54 = vadd.f32 %v4419_v50, %v1452_v30  ;;  %v1692_v63 = vadd.f32 %v4435_v18, %v1454_v40 }
 0x148   : > { %v4451_v51 = vpop.f32.mrf.mxu0 }
 0x149   : > { %v4460_v60 = vpop.f32.mrf.mxu1 }
 0x14a   : > { %v3333_v17 = vpop.f32.mrf.mxu0 }
 0x14b   : > { %v3307_v0 = vpop.f32.mrf.mxu1 }
 0x14c   : > { %v2168_v43 = vadd.f32 %v3307_v0, %v1922_v11  ;;  %v2326_v5 = vpop.f32.mrf.mxu0  ;;  %v4709_v11 = vld [vmem:[#allocation6_spill] sm:$0xff] }
 0x14d   : > { %v2088_v59 = vpop.f32.mrf.mxu1  ;;  %v1688_v29 = vadd.f32 %v4709_v11, %v1450_v20 }
 0x14e   : > { %v2406_v47 = vadd.f32 %v3333_v17, %v2168_v43  ;;  %v2167_v8 = vadd.f32 %v2088_v59, %v1921_v58  ;;  %v3336_v27 = vpop.f32.mrf.mxu0  ;;  %v4710_v17 = vld [vmem:[#allocation18_spill] sm:$0xff]  ;;  %v1928_v43 = vadd.f32 %v4711_v52, %v1687_v61 }
 0x14f   : > { %v3310_v31 = vpop.f32.mrf.mxu1  ;;  %v1691_v19 = vadd.f32 %v4710_v17, %v1453_v35  ;;  %v1929_v53 = vadd.f32 %v4714_v39, %v1688_v29 }
 0x150   : > { %2423 = vst.msk [vmem:[%s4481_s22 + $0x8] sm:$0xff] %vm2421_vm4, %v2406_v47  ;;  %v2487_v28 = vmul.f32 %v2406_v47, %v2406_v47  ;;  %v2405_v49 = vadd.f32 %v2326_v5, %v2167_v8  ;;  %v2170_v10 = vadd.f32 %v3310_v31, %v1924_v33  ;;  %v2336_v1 = vpop.f32.mrf.mxu0  ;;  %v2446_v57 = vsel %vm2421_vm4, %v2406_v47, 0.0  ;;  %v4712_v5 = vld [vmem:[#allocation16_spill] sm:$0xff]  ;;  %v4713_v33 = vld [vmem:[#allocation17_spill] sm:$0xff] }
 0x151   : > { %v2098_v7 = vpop.f32.mrf.mxu1  ;;  %v1927_v20 = vadd.f32 %v4712_v5, %v1686_v56  ;;  %v1930_v47 = vadd.f32 %v4713_v33, %v1689_v15  ;;  %v1932_v21 = vadd.f32 %v4715_v2, %v1691_v19 }
 0x152   : > { %2422 = vst.msk [vmem:[%s4481_s22] sm:$0xff] %vm2421_vm4, %v2405_v49  ;;  %v2445_v46 = vsel %vm2421_vm4, %v2405_v49, 0.0  ;;  %v2486_v62 = vmul.f32 %v2405_v49, %v2405_v49  ;;  %v2408_v44 = vadd.f32 %v3336_v27, %v2170_v10  ;;  %v3339_v37 = vpop.f32.mrf.mxu0  ;;  %v2169_v48 = vadd.f32 %v2098_v7, %v1923_v3 }
 0x153   : > { %v2447_v6 = vadd.f32 %v2446_v57, %v2445_v46  ;;  %v3313_v14 = vpop.f32.mrf.mxu1  ;;  %v2503_v25 = vsel %vm2421_vm4, %v2487_v28, 0.0  ;;  %v1693_v28 = vadd.f32 %v4426_v45, %v1455_v41 }
 0x154   : > { %v2502_v0 = vsel %vm2421_vm4, %v2486_v62, 0.0  ;;  %2425 = vst.msk [vmem:[%s4481_s22 + $0x18] sm:$0xff] %vm2421_vm4, %v2408_v44  ;;  %v2172_v4 = vadd.f32 %v3313_v14, %v1926_v16  ;;  %v2346_v58 = vpop.f32.mrf.mxu0  ;;  %v2407_v35 = vadd.f32 %v2336_v1, %v2169_v48  ;;  %v2489_v50 = vmul.f32 %v2408_v44, %v2408_v44 }
 0x155   : > { %v2504_v32 = vadd.f32 %v2503_v25, %v2502_v0  ;;  %v2108_v59 = vpop.f32.mrf.mxu1  ;;  %v1931_v16 = vadd.f32 %v4417_v9, %v1690_v54  ;;  %v1934_v46 = vadd.f32 %v4422_v34, %v1693_v28 }
 0x156   : > { %v2410_v30 = vadd.f32 %v3339_v37, %v2172_v4  ;;  %v2171_v8 = vadd.f32 %v2108_v59, %v1925_v24  ;;  %v3342_v27 = vpop.f32.mrf.mxu0  ;;  %2424 = vst.msk [vmem:[%s4481_s22 + $0x10] sm:$0xff] %vm2421_vm4, %v2407_v35  ;;  %v2448_v3 = vsel %vm2421_vm4, %v2407_v35, 0.0  ;;  %v2488_v31 = vmul.f32 %v2407_v35, %v2407_v35 }
 0x157   : > { %v3316_v42 = vpop.f32.mrf.mxu1  ;;  %v2449_v49 = vadd.f32 %v2448_v3, %v2447_v6  ;;  %v2450_v24 = vsel %vm2421_vm4, %v2408_v44, 0.0  ;;  %v2507_v56 = vsel %vm2421_vm4, %v2489_v50, 0.0  ;;  %v1933_v4 = vadd.f32 %v4431_v13, %v1692_v63 }
 0x158   : > { %2427 = vst.msk [vmem:[%s4481_s22 + $0x28] sm:$0xff] %vm2421_vm4, %v2410_v30  ;;  %v2409_v10 = vadd.f32 %v2346_v58, %v2171_v8  ;;  %v2356_v1 = vpop.f32.mrf.mxu0  ;;  %v2505_v38 = vsel %vm2421_vm4, %v2488_v31, 0.0  ;;  %v2174_v61 = vadd.f32 %v3316_v42, %v1928_v43  ;;  %v2491_v15 = vmul.f32 %v2410_v30, %v2410_v30 }
 0x159   : > { %v2118_v23 = vpop.f32.mrf.mxu1  ;;  %v2506_v22 = vadd.f32 %v2505_v38, %v2504_v32  ;;  %v2451_v45 = vadd.f32 %v2450_v24, %v2449_v49  ;;  %v2454_v29 = vsel %vm2421_vm4, %v2410_v30, 0.0  ;;  %v1694_v32 = vadd.f32 %v4460_v60, %v4490_v12 }
 0x15a   : > { %2426 = vst.msk [vmem:[%s4481_s22 + $0x20] sm:$0xff] %vm2421_vm4, %v2409_v10  ;;  %v2452_v9 = vsel %vm2421_vm4, %v2409_v10, 0.0  ;;  %v3345_v41 = vpop.f32.mrf.mxu0  ;;  %v2490_v7 = vmul.f32 %v2409_v10, %v2409_v10  ;;  %v2412_v57 = vadd.f32 %v3342_v27, %v2174_v61  ;;  %v2173_v18 = vadd.f32 %v2118_v23, %v1927_v20 }
 0x15b   : > { %v3319_v40 = vpop.f32.mrf.mxu1  ;;  %v2453_v62 = vadd.f32 %v2452_v9, %v2451_v45  ;;  %v2508_v44 = vadd.f32 %v2507_v56, %v2506_v22  ;;  %v2511_v58 = vsel %vm2421_vm4, %v2491_v15, 0.0  ;;  %v1695_v20 = vadd.f32 %v4443_v36, %v4487_v55 }
 0x15c   : > { %v2176_v37 = vadd.f32 %v3319_v40, %v1930_v47  ;;  %v2366_v11 = vpop.f32.mrf.mxu0  ;;  %v2509_v17 = vsel %vm2421_vm4, %v2490_v7, 0.0  ;;  %2429 = vst.msk [vmem:[%s4481_s22 + $0x38] sm:$0xff] %vm2421_vm4, %v2412_v57  ;;  %v2493_v19 = vmul.f32 %v2412_v57, %v2412_v57  ;;  %v2411_v6 = vadd.f32 %v2356_v1, %v2173_v18 }
 0x15d   : > { %v2128_v48 = vpop.f32.mrf.mxu1  ;;  %v2510_v14 = vadd.f32 %v2509_v17, %v2508_v44  ;;  %v2455_v54 = vadd.f32 %v2454_v29, %v2453_v62  ;;  %v2458_v33 = vsel %vm2421_vm4, %v2412_v57, 0.0  ;;  %v1936_v1 = vadd.f32 %v4439_v26, %v1695_v20 }
 0x15e   : > { %v2414_v25 = vadd.f32 %v3345_v41, %v2176_v37  ;;  %v2175_v0 = vadd.f32 %v2128_v48, %v1929_v53  ;;  %v3348_v34 = vpop.f32.mrf.mxu0  ;;  %2428 = vst.msk [vmem:[%s4481_s22 + $0x30] sm:$0xff] %vm2421_vm4, %v2411_v6  ;;  %v2456_v52 = vsel %vm2421_vm4, %v2411_v6, 0.0  ;;  %v2492_v43 = vmul.f32 %v2411_v6, %v2411_v6 }
 0x15f   : > { %v3322_v5 = vpop.f32.mrf.mxu1  ;;  %v2457_v35 = vadd.f32 %v2456_v52, %v2455_v54  ;;  %v2512_v59 = vadd.f32 %v2511_v58, %v2510_v14  ;;  %v2515_v27 = vsel %vm2421_vm4, %v2493_v19, 0.0 }
 0x160   : > { %2431 = vst.msk [vmem:[%s4481_s22 + $0x48] sm:$0xff] %vm2421_vm4, %v2414_v25  ;;  %v2376_v13 = vpop.f32.mrf.mxu0  ;;  %v2513_v47 = vsel %vm2421_vm4, %v2492_v43, 0.0  ;;  %v2413_v50 = vadd.f32 %v2366_v11, %v2175_v0  ;;  %v2178_v30 = vadd.f32 %v3322_v5, %v1932_v21  ;;  %v2495_v60 = vmul.f32 %v2414_v25, %v2414_v25 }
 0x161   : > { %v2138_v8 = vpop.f32.mrf.mxu1  ;;  %v2514_v39 = vadd.f32 %v2513_v47, %v2512_v59  ;;  %v2459_v36 = vadd.f32 %v2458_v33, %v2457_v35  ;;  %v2462_v63 = vsel %vm2421_vm4, %v2414_v25, 0.0 }
 0x162   : > { %v2177_v55 = vadd.f32 %v2138_v8, %v1931_v16  ;;  %v3351_v53 = vpop.f32.mrf.mxu0  ;;  %2430 = vst.msk [vmem:[%s4481_s22 + $0x40] sm:$0xff] %vm2421_vm4, %v2413_v50  ;;  %v2460_v12 = vsel %vm2421_vm4, %v2413_v50, 0.0  ;;  %v2494_v2 = vmul.f32 %v2413_v50, %v2413_v50  ;;  %v2416_v3 = vadd.f32 %v3348_v34, %v2178_v30 }
 0x163   : > { %v3325_v31 = vpop.f32.mrf.mxu1  ;;  %v2461_v42 = vadd.f32 %v2460_v12, %v2459_v36  ;;  %v2516_v28 = vadd.f32 %v2515_v27, %v2514_v39  ;;  %v1935_v16 = vadd.f32 %v4451_v51, %v1694_v32  ;;  %v2519_v45 = vsel %vm2421_vm4, %v2495_v60, 0.0 }
 0x164   : > { %v2415_v21 = vadd.f32 %v2376_v13, %v2177_v55  ;;  %v2180_v49 = vadd.f32 %v3325_v31, %v1934_v46  ;;  %v2386_v10 = vpop.f32.mrf.mxu0  ;;  %v2517_v24 = vsel %vm2421_vm4, %v2494_v2, 0.0  ;;  %2433 = vst.msk [vmem:[%s4481_s22 + $0x58] sm:$0xff] %vm2421_vm4, %v2416_v3  ;;  %v2497_v26 = vmul.f32 %v2416_v3, %v2416_v3 }
 0x165   : > { %v2148_v38 = vpop.f32.mrf.mxu1  ;;  %v2518_v61 = vadd.f32 %v2517_v24, %v2516_v28  ;;  %v2463_v23 = vadd.f32 %v2462_v63, %v2461_v42  ;;  %v2466_v46 = vsel %vm2421_vm4, %v2416_v3, 0.0  ;;  %v2444_v42 = vld [vmem:[%s4294_s7] sm:$0x1] }
 0x166   : > { %2432 = vst.msk [vmem:[%s4481_s22 + $0x50] sm:$0xff] %vm2421_vm4, %v2415_v21  ;;  %v2464_v56 = vsel %vm2421_vm4, %v2415_v21, 0.0  ;;  %v2496_v22 = vmul.f32 %v2415_v21, %v2415_v21  ;;  %v2418_v9 = vadd.f32 %v3351_v53, %v2180_v49  ;;  %v2179_v51 = vadd.f32 %v2148_v38, %v1933_v4  ;;  %v3354_v40 = vpop.f32.mrf.mxu0  ;;  %v2485_v49 = vld [vmem:[%s4299_s10] sm:$0x1] }
 0x167   : > { %v3328_v41 = vpop.f32.mrf.mxu1  ;;  %v2465_v15 = vadd.f32 %v2464_v56, %v2463_v23  ;;  %v2520_v7 = vadd.f32 %v2519_v45, %v2518_v61  ;;  %v2523_v19 = vsel %vm2421_vm4, %v2497_v26, 0.0 }
 0x168   : > { %v2521_v57 = vsel %vm2421_vm4, %v2496_v22, 0.0  ;;  %v2182_v18 = vadd.f32 %v3328_v41, %v1936_v1  ;;  %2435 = vst.msk [vmem:[%s4481_s22 + $0x68] sm:$0xff] %vm2421_vm4, %v2418_v9  ;;  %v2417_v62 = vadd.f32 %v2386_v10, %v2179_v51  ;;  %v2499_v6 = vmul.f32 %v2418_v9, %v2418_v9  ;;  %v2396_v0 = vpop.f32.mrf.mxu0 }
 0x169   : > { %v2158_v44 = vpop.f32.mrf.mxu1  ;;  %v2522_v37 = vadd.f32 %v2521_v57, %v2520_v7  ;;  %v2467_v11 = vadd.f32 %v2466_v46, %v2465_v15  ;;  %v2470_v34 = vsel %vm2421_vm4, %v2418_v9, 0.0 }
 0x16a   : > { %v2420_v29 = vadd.f32 %v3354_v40, %v2182_v18  ;;  %v2181_v17 = vadd.f32 %v2158_v44, %v1935_v16  ;;  %2434 = vst.msk [vmem:[%s4481_s22 + $0x60] sm:$0xff] %vm2421_vm4, %v2417_v62  ;;  %v2468_v48 = vsel %vm2421_vm4, %v2417_v62, 0.0  ;;  %v2498_v14 = vmul.f32 %v2417_v62, %v2417_v62 }
 0x16b   : > { %v2469_v54 = vadd.f32 %v2468_v48, %v2467_v11  ;;  %v2524_v25 = vadd.f32 %v2523_v19, %v2522_v37  ;;  %v2527_v5 = vsel %vm2421_vm4, %v2499_v6, 0.0 }
 0x16c   : > { %2437 = vst.msk [vmem:[%s4481_s22 + $0x78] sm:$0xff] %vm2421_vm4, %v2420_v29  ;;  %v2525_v4 = vsel %vm2421_vm4, %v2498_v14, 0.0  ;;  %v2419_v58 = vadd.f32 %v2396_v0, %v2181_v17  ;;  %v2501_v20 = vmul.f32 %v2420_v29, %v2420_v29  ;;  %v2474_v33 = vsel %vm2421_vm4, %v2420_v29, 0.0 }
 0x16d   : > { %v2526_v52 = vadd.f32 %v2525_v4, %v2524_v25  ;;  %v2471_v43 = vadd.f32 %v2470_v34, %v2469_v54 }
 0x16e   : > { %2436 = vst.msk [vmem:[%s4481_s22 + $0x70] sm:$0xff] %vm2421_vm4, %v2419_v58  ;;  %v2472_v32 = vsel %vm2421_vm4, %v2419_v58, 0.0  ;;  %v2500_v35 = vmul.f32 %v2419_v58, %v2419_v58  ;;  %v2531_v8 = vsel %vm2421_vm4, %v2501_v20, 0.0 }
 0x16f   : > { %v2473_v59 = vadd.f32 %v2472_v32, %v2471_v43  ;;  %v2528_v13 = vadd.f32 %v2527_v5, %v2526_v52 }
 0x170   : > { %v2529_v47 = vsel %vm2421_vm4, %v2500_v35, 0.0 }
 0x171   : > { %v2475_v50 = vadd.f32 %v2474_v33, %v2473_v59  ;;  %v2530_v30 = vadd.f32 %v2529_v47, %v2528_v13 }
 0x173   : > { %v2476_v27 = vrot.slane %v2475_v50, 4  ;;  %v2532_v39 = vadd.f32 %v2531_v8, %v2530_v30 }
 0x175   : > { %v2477_v36 = vadd.f32 %v2476_v27, %v2475_v50  ;;  %v2533_v55 = vrot.slane %v2532_v39, 4 }
 0x177   : > { %v2478_v53 = vrot.slane %v2477_v36, 2  ;;  %v2534_v60 = vadd.f32 %v2533_v55, %v2532_v39 }
 0x179   : > { %v2479_v12 = vadd.f32 %v2478_v53, %v2477_v36  ;;  %v2535_v2 = vrot.slane %v2534_v60, 2 }
 0x17b   : > { %v2480_v3 = vrot.slane %v2479_v12, 1  ;;  %v2536_v31 = vadd.f32 %v2535_v2, %v2534_v60 }
 0x17d   : > { %v2481_v28 = vadd.f32 %v2480_v3, %v2479_v12  ;;  %v2537_v21 = vrot.slane %v2536_v31, 1 }
 0x17f   : > { %v2482_v10 = vadd.f32 %v2481_v28, %v2444_v42  ;;  %v2538_v1 = vadd.f32 %v2537_v21, %v2536_v31 }
 0x181   : > { %2484 = vst.msk [vmem:[%s4294_s7] sm:$0x1] %vm2483_vm5, %v2482_v10  ;;  %v2539_v16 = vadd.f32 %v2538_v1, %v2485_v49 }
 0x183   : > { %2540 = vst.msk [vmem:[%s4299_s10] sm:$0x1] %vm2483_vm5, %v2539_v16 }
 0x184 PF: > { %s15_s19 = sadd.s32 1, %s3437_s19   ;;  %s4716_s15 = smov %s3429_s17 }
 0x185   : > { %p12_p8 = scmp.ge.s32.totalorder %s15_s19, 6   ;;  %s4717_s16 = smov %s3433_s18 }
 0x186   : > { %s4718_s17 = smov %s4721_s20  ;;  %s4719_s18 = smov %s4725_s21 }
 0x187   :  { %14 = sbr.rel (!%p12_p8) target bundleno = 3 (0x3), region = 97 }

</bundles_post_ra>
